<compile_context>
chip_gen: v5e
topology: v5e:2x2
jax: 0.10.0
libtpu: 0.0.40
codegen_flags: <defaults>
</compile_context>

<pallas_src>
import functools
import math

import jax
import jax.numpy as jnp
from jax.experimental import pallas as pl
from jax.experimental.pallas import tpu as pltpu

_BN_EPS = 1e-5
_SQRT_HALF = 0.7071067811865476

# Feed the MXU bf16 operands (f32 accumulation) for full bf16 MXU rate on
# v6e/v7x.  Default False to keep f32 numerical parity with the PyTorch model
# (elementwise/GELU math stays f32 either way, as required on v5e).
_MXU_BF16 = False


# ---------------------------------------------------------------------------
# Elementwise helpers (f32, VPU/EUP-friendly ops only)
# ---------------------------------------------------------------------------
def _erf(x):
    # Abramowitz & Stegun 7.1.26 polynomial (|err| < 1.5e-7).
    a1, a2, a3, a4, a5 = (0.254829592, -0.284496736, 1.421413741,
                          -1.453152027, 1.061405429)
    p = 0.3275911
    ax = jnp.abs(x)
    t = 1.0 / (1.0 + p * ax)
    poly = ((((a5 * t + a4) * t + a3) * t + a2) * t + a1) * t
    y = 1.0 - poly * jnp.exp(-ax * ax)
    return jnp.where(x >= 0.0, y, -y)


def _gelu_exact(x):
    # F.gelu default ("none" approximation): 0.5 * x * (1 + erf(x / sqrt(2)))
    return 0.5 * x * (1.0 + _erf(x * _SQRT_HALF))


# ---------------------------------------------------------------------------
# Static layer plan (all Python ints -> static inside the kernel)
# ---------------------------------------------------------------------------
def _layer_plan(num_haplotypes, length, hidden_dim):
    h8, h4, h2, h = (hidden_dim // 8, hidden_dim // 4,
                     hidden_dim // 2, hidden_dim)
    stem = [('c1', num_haplotypes, h8, 15, 7, 1),
            ('c2', h8, h4, 11, 5, 2),
            ('c3', h4, h2, 7, 3, 2),
            ('c4', h2, h, 5, 2, 2)]
    plan = []
    L = length
    for name, cin, cout, K, pad, stride in stem:
        L_out = (L + 2 * pad - K) // stride + 1
        assert L_out >= 1, f"{name}: sequence too short (L={L})"
        plan.append(dict(name=name, cin=cin, cout=cout, K=K, pad=pad,
                         stride=stride, L_in=L, L_out=L_out))
        L = L_out
    return plan, L  # L = length entering the residual blocks / pooling


# ---------------------------------------------------------------------------
# Fused whole-network kernel (one grid step == one batch element)
# ---------------------------------------------------------------------------
def _make_kernel(plan, l_res):
    n_stem = len(plan)        # 4 stem convs
    n_conv = n_stem + 4       # + 2 residual blocks x 2 convs

    def kernel(*refs):
        idx = 0
        x_ref = refs[idx]; idx += 1
        cw = refs[idx: idx + 2 * n_conv]; idx += 2 * n_conv          # (w, sb)*
        fc1_w, fc1_b, fc2_w, fc2_b, fc3_w, fc3_b = refs[idx: idx + 6]; idx += 6
        o_ref = refs[idx]; idx += 1
        act_bufs = refs[idx: idx + n_stem]; idx += n_stem            # padded acts
        buf_a, buf_b, col_buf = refs[idx: idx + 3]                   # res + im2col

        # --- zero the halo (== conv zero padding) of every activation buffer.
        for buf in (*act_bufs, buf_a, buf_b):
            buf[...] = jnp.zeros_like(buf)

        # --- place this sample into the padded conv1 input buffer.
        p0, l0 = plan[0]['pad'], plan[0]['L_in']
        act_bufs[0][p0:p0 + l0, :] = x_ref[0]

        def conv_bn(src_ref, w_ref, sb_ref, K, stride, c_in, l_out,
                    residual=None, relu=True):
            """Conv1d (zero-padded src in VMEM, stride folded into the gather)
            + fused BatchNorm(eval) affine + optional residual + ReLU."""
            # im2col: scatter the K shifted/strided views at static lane
            # offsets, then ONE MXU matmul with the (K*c_in, c_out) weight.
            for k in range(K):
                sl = (pl.ds(k, l_out) if stride == 1
                      else pl.ds(k, l_out, stride=stride))
                col_buf[0:l_out, k * c_in:(k + 1) * c_in] = src_ref[sl, :]
            lhs = col_buf[0:l_out, 0:K * c_in]
            w = w_ref[...]
            if _MXU_BF16:
                lhs = lhs.astype(jnp.bfloat16)
                w = w.astype(jnp.bfloat16)
            y = jnp.dot(lhs, w, preferred_element_type=jnp.float32)
            sb = sb_ref[...]                       # (2, c_out): [scale; bias]
            y = y * sb[0:1, :] + sb[1:2, :]
            if residual is not None:
                y = y + residual
            if relu:
                y = jnp.maximum(y, 0.0)
            return y

        # --- stem: conv1..conv4 (+BN+ReLU), strided outputs computed directly.
        for i, cfg in enumerate(plan):
            y = conv_bn(act_bufs[i], cw[2 * i], cw[2 * i + 1],
                        cfg['K'], cfg['stride'], cfg['cin'], cfg['L_out'])
            if i + 1 < n_stem:
                dst, dp = act_bufs[i + 1], plan[i + 1]['pad']
            else:
                dst, dp = buf_a, 1                 # residual-block buffer, pad 1
            dst[dp:dp + cfg['L_out'], :] = y

        # --- residual blocks (identity skip): relu(bn2(conv2(relu(bn1(conv1(x))))) + x)
        hdim = buf_a.shape[1]
        y = None
        for blk in range(2):
            w1, sb1, w2, sb2 = cw[2 * n_stem + 4 * blk: 2 * n_stem + 4 * blk + 4]
            h = conv_bn(buf_a, w1, sb1, 3, 1, hdim, l_res)
            buf_b[1:1 + l_res, :] = h
            res = buf_a[1:1 + l_res, :]
            y = conv_bn(buf_b, w2, sb2, 3, 1, hdim, l_res,
                        residual=res, relu=True)
            if blk == 0:                           # feed block 2
                buf_a[1:1 + l_res, :] = y

        # --- head: global average pool + fc1/GELU + fc2/ReLU + fc3
        pooled = jnp.mean(y, axis=0, keepdims=True)       # (1, hidden)

        def dense(v, w_ref, b_ref):
            w = w_ref[...]
            if _MXU_BF16:
                v = v.astype(jnp.bfloat16)
                w = w.astype(jnp.bfloat16)
            return jnp.dot(v, w, preferred_element_type=jnp.float32) + b_ref[...]

        h1 = _gelu_exact(dense(pooled, fc1_w, fc1_b))
        h2 = jnp.maximum(dense(h1, fc2_w, fc2_b), 0.0)
        o_ref[0] = dense(h2, fc3_w, fc3_b).astype(o_ref.dtype)

    return kernel


# ---------------------------------------------------------------------------
# Wrapper: one pallas_call for the whole forward pass
# ---------------------------------------------------------------------------
def _const_map(*_, ndim):
    return (0,) * ndim


def cnn1d_large_forward(x_ncl, params):
    """x_ncl: (B, num_haplotypes, max_variants) as in PyTorch (NCL)."""
    B, c_in, l_in = x_ncl.shape
    hidden = params['fc1_w'].shape[0]
    t_out = params['fc3_w'].shape[1]
    plan, l_res = _layer_plan(c_in, l_in, hidden)

    # NCL -> channels-last (B, L, C); single tiny transpose of the raw input.
    x = jnp.transpose(x_ncl, (0, 2, 1)).astype(jnp.float32)

    conv_names = ('c1', 'c2', 'c3', 'c4', 'rb1a', 'rb1b', 'rb2a', 'rb2b')
    weight_args = []
    for name in conv_names:
        weight_args += [params[f'{name}_w'], params[f'{name}_sb']]
    weight_args += [params['fc1_w'], params['fc1_b'],
                    params['fc2_w'], params['fc2_b'],
                    params['fc3_w'], params['fc3_b']]

    in_specs = [pl.BlockSpec((1, l_in, c_in), lambda b: (b, 0, 0))]
    for a in weight_args:
        in_specs.append(
            pl.BlockSpec(a.shape, functools.partial(_const_map, ndim=a.ndim)))
    out_specs = pl.BlockSpec((1, 1, t_out), lambda b: (b, 0, 0))

    # VMEM scratch: per-layer zero-halo activation buffers + im2col staging.
    buf_shapes = [(cfg['L_in'] + 2 * cfg['pad'], cfg['cin']) for cfg in plan]
    buf_shapes += [(l_res + 2, hidden), (l_res + 2, hidden)]
    col_rows = max(max(cfg['L_out'] for cfg in plan), l_res)
    col_cols = max([cfg['K'] * cfg['cin'] for cfg in plan] + [3 * hidden])
    scratch = [pltpu.VMEM(s, jnp.float32) for s in buf_shapes]
    scratch.append(pltpu.VMEM((col_rows, col_cols), jnp.float32))

    out = pl.pallas_call(
        _make_kernel(plan, l_res),
        out_shape=jax.ShapeDtypeStruct((B, 1, t_out), jnp.float32),
        grid=(B,),
        in_specs=in_specs,
        out_specs=out_specs,
        scratch_shapes=scratch,
        compiler_params=pltpu.CompilerParams(
            dimension_semantics=("parallel",),     # batch shards across TCs
            vmem_limit_bytes=32 * 1024 * 1024),    # explicit, fits v5e/v6e/v7x
    )(x, *weight_args)
    return out.reshape(B, t_out)


# ---------------------------------------------------------------------------
# Deterministic parameter initialization (PyTorch-shaped distributions,
# stored in kernel-friendly layouts: im2col weights, fused BN scale/bias)
# ---------------------------------------------------------------------------
def _conv_weight(key, cin, cout, k, with_bias):
    bound = 1.0 / math.sqrt(cin * k)
    kw, kb = jax.random.split(key)
    w = jax.random.uniform(kw, (k, cin, cout), jnp.float32, -bound, bound)
    b = (jax.random.uniform(kb, (cout,), jnp.float32, -bound, bound)
         if with_bias else None)
    return w, b


def _linear_weight(key, cin, cout):
    bound = 1.0 / math.sqrt(cin)
    kw, kb = jax.random.split(key)
    w = jax.random.uniform(kw, (cin, cout), jnp.float32, -bound, bound)
    b = jax.random.uniform(kb, (1, cout), jnp.float32, -bound, bound)
    return w, b


def _bn_fused(conv_bias, c):
    # Eval-mode BN with PyTorch-init running stats (mean=0, var=1, g=1, b=0),
    # fused with the conv bias into a (2, C) [scale; bias] table.
    gamma = jnp.ones((c,), jnp.float32)
    beta = jnp.zeros((c,), jnp.float32)
    mean = jnp.zeros((c,), jnp.float32)
    var = jnp.ones((c,), jnp.float32)
    scale = gamma / jnp.sqrt(var + _BN_EPS)
    bias = beta - mean * scale
    if conv_bias is not None:
        bias = bias + conv_bias * scale
    return jnp.stack([scale, bias]).astype(jnp.float32)


def init_params(key, num_haplotypes, hidden_dim, num_time_points):
    assert hidden_dim % 8 == 0
    h8, h4, h2, h = (hidden_dim // 8, hidden_dim // 4,
                     hidden_dim // 2, hidden_dim)
    keys = jax.random.split(key, 11)
    p = {}

    # Stem convs (bias=True) + fused eval BN; weights stored as (K*C_in, C_out).
    stem = [('c1', num_haplotypes, h8, 15), ('c2', h8, h4, 11),
            ('c3', h4, h2, 7), ('c4', h2, h, 5)]
    for i, (name, cin, cout, k) in enumerate(stem):
        w, b = _conv_weight(keys[i], cin, cout, k, with_bias=True)
        p[f'{name}_w'] = w.reshape(k * cin, cout)
        p[f'{name}_sb'] = _bn_fused(b, cout)

    # Residual-block convs (bias=False, K=3, stride=1, identity skip).
    for j, name in enumerate(('rb1a', 'rb1b', 'rb2a', 'rb2b')):
        w, _ = _conv_weight(keys[4 + j], h, h, 3, with_bias=False)
        p[f'{name}_w'] = w.reshape(3 * h, h)
        p[f'{name}_sb'] = _bn_fused(None, h)

    # Fully connected head (weights stored transposed: (in, out)).
    p['fc1_w'], p['fc1_b'] = _linear_weight(keys[8], h, h)
    p['fc2_w'], p['fc2_b'] = _linear_weight(keys[9], h, h2)
    p['fc3_w'], p['fc3_b'] = _linear_weight(keys[10], h2, num_time_points)
    return p


if __name__ == "__main__":
    # CNN1D_Large(num_haplotypes=4, max_variants=16, num_time_points=8,
    # hidden_dim=32), batch=2.  Input is NCL: (B, C, L).
    num_haplotypes, max_variants, num_time_points, hidden_dim = 4, 16, 8, 32
    batch = 2

    key = jax.random.PRNGKey(0)
    kx, kp = jax.random.split(key)
    x = jax.random.normal(kx, (batch, num_haplotypes, max_variants), jnp.float32)
    params = init_params(kp, num_haplotypes, hidden_dim, num_time_points)

    out = jax.jit(cnn1d_large_forward)(x, params)
    out = jax.block_until_ready(out)
    assert out.shape == (batch, num_time_points), out.shape
    assert bool(jnp.all(jnp.isfinite(out)))
    print("KERNEL_OK")
</pallas_src>

<mosaic_0001>
module attributes {stable_mosaic.version = 11 : i64} {
  func.func @kernel(%arg0: i32, %arg1: memref<1x16x4xf32, #tpu.memory_space<vmem>>, %arg2: memref<60x4xf32, #tpu.memory_space<vmem>>, %arg3: memref<2x4xf32, #tpu.memory_space<vmem>>, %arg4: memref<44x8xf32, #tpu.memory_space<vmem>>, %arg5: memref<2x8xf32, #tpu.memory_space<vmem>>, %arg6: memref<56x16xf32, #tpu.memory_space<vmem>>, %arg7: memref<2x16xf32, #tpu.memory_space<vmem>>, %arg8: memref<80x32xf32, #tpu.memory_space<vmem>>, %arg9: memref<2x32xf32, #tpu.memory_space<vmem>>, %arg10: memref<96x32xf32, #tpu.memory_space<vmem>>, %arg11: memref<2x32xf32, #tpu.memory_space<vmem>>, %arg12: memref<96x32xf32, #tpu.memory_space<vmem>>, %arg13: memref<2x32xf32, #tpu.memory_space<vmem>>, %arg14: memref<96x32xf32, #tpu.memory_space<vmem>>, %arg15: memref<2x32xf32, #tpu.memory_space<vmem>>, %arg16: memref<96x32xf32, #tpu.memory_space<vmem>>, %arg17: memref<2x32xf32, #tpu.memory_space<vmem>>, %arg18: memref<32x32xf32, #tpu.memory_space<vmem>>, %arg19: memref<1x32xf32, #tpu.memory_space<vmem>>, %arg20: memref<32x16xf32, #tpu.memory_space<vmem>>, %arg21: memref<1x16xf32, #tpu.memory_space<vmem>>, %arg22: memref<16x8xf32, #tpu.memory_space<vmem>>, %arg23: memref<1x8xf32, #tpu.memory_space<vmem>>, %arg24: memref<1x1x8xf32, #tpu.memory_space<vmem>>, %arg25: memref<30x4xf32, #tpu.memory_space<vmem>>, %arg26: memref<26x4xf32, #tpu.memory_space<vmem>>, %arg27: memref<14x8xf32, #tpu.memory_space<vmem>>, %arg28: memref<8x16xf32, #tpu.memory_space<vmem>>, %arg29: memref<4x32xf32, #tpu.memory_space<vmem>>, %arg30: memref<4x32xf32, #tpu.memory_space<vmem>>, %arg31: memref<16x96xf32, #tpu.memory_space<vmem>>) attributes {dimension_semantics = [#tpu.dimension_semantics<parallel>], iteration_bounds = array<i64: 2>, scalar_prefetch = 0 : i64, scratch_operands = 7 : i64, tpu.core_type = #tpu.core_type<tc>, window_params = [{transform_indices = @transform_0, window_bounds = array<i64: 1, 16, 4>}, {pipeline_mode = #tpu.pipeline_mode<synchronous>, transform_indices = @transform_1, window_bounds = array<i64: 60, 4>}, {pipeline_mode = #tpu.pipeline_mode<synchronous>, transform_indices = @transform_2, window_bounds = array<i64: 2, 4>}, {pipeline_mode = #tpu.pipeline_mode<synchronous>, transform_indices = @transform_3, window_bounds = array<i64: 44, 8>}, {pipeline_mode = #tpu.pipeline_mode<synchronous>, transform_indices = @transform_4, window_bounds = array<i64: 2, 8>}, {pipeline_mode = #tpu.pipeline_mode<synchronous>, transform_indices = @transform_5, window_bounds = array<i64: 56, 16>}, {pipeline_mode = #tpu.pipeline_mode<synchronous>, transform_indices = @transform_6, window_bounds = array<i64: 2, 16>}, {pipeline_mode = #tpu.pipeline_mode<synchronous>, transform_indices = @transform_7, window_bounds = array<i64: 80, 32>}, {pipeline_mode = #tpu.pipeline_mode<synchronous>, transform_indices = @transform_8, window_bounds = array<i64: 2, 32>}, {pipeline_mode = #tpu.pipeline_mode<synchronous>, transform_indices = @transform_9, window_bounds = array<i64: 96, 32>}, {pipeline_mode = #tpu.pipeline_mode<synchronous>, transform_indices = @transform_10, window_bounds = array<i64: 2, 32>}, {pipeline_mode = #tpu.pipeline_mode<synchronous>, transform_indices = @transform_11, window_bounds = array<i64: 96, 32>}, {pipeline_mode = #tpu.pipeline_mode<synchronous>, transform_indices = @transform_12, window_bounds = array<i64: 2, 32>}, {pipeline_mode = #tpu.pipeline_mode<synchronous>, transform_indices = @transform_13, window_bounds = array<i64: 96, 32>}, {pipeline_mode = #tpu.pipeline_mode<synchronous>, transform_indices = @transform_14, window_bounds = array<i64: 2, 32>}, {pipeline_mode = #tpu.pipeline_mode<synchronous>, transform_indices = @transform_15, window_bounds = array<i64: 96, 32>}, {pipeline_mode = #tpu.pipeline_mode<synchronous>, transform_indices = @transform_16, window_bounds = array<i64: 2, 32>}, {pipeline_mode = #tpu.pipeline_mode<synchronous>, transform_indices = @transform_17, window_bounds = array<i64: 32, 32>}, {pipeline_mode = #tpu.pipeline_mode<synchronous>, transform_indices = @transform_18, window_bounds = array<i64: 1, 32>}, {pipeline_mode = #tpu.pipeline_mode<synchronous>, transform_indices = @transform_19, window_bounds = array<i64: 32, 16>}, {pipeline_mode = #tpu.pipeline_mode<synchronous>, transform_indices = @transform_20, window_bounds = array<i64: 1, 16>}, {pipeline_mode = #tpu.pipeline_mode<synchronous>, transform_indices = @transform_21, window_bounds = array<i64: 16, 8>}, {pipeline_mode = #tpu.pipeline_mode<synchronous>, transform_indices = @transform_22, window_bounds = array<i64: 1, 8>}, {transform_indices = @transform_23, window_bounds = array<i64: 1, 1, 8>}]} {
    %cst = arith.constant 0.000000e+00 : f32
    %0 = vector.broadcast %cst : f32 to vector<30x4xf32>
    %c0 = arith.constant 0 : index
    %c0_0 = arith.constant 0 : index
    %1 = vector.load %arg25[%c0, %c0_0] : memref<30x4xf32, #tpu.memory_space<vmem>>, vector<30x4xf32>
    tpu.vector_store %arg25[%c0, %c0_0], %0 {strides = array<i32>} : memref<30x4xf32, #tpu.memory_space<vmem>>, vector<30x4xf32>,
    %cst_1 = arith.constant 0.000000e+00 : f32
    %2 = vector.broadcast %cst_1 : f32 to vector<26x4xf32>
    %c0_2 = arith.constant 0 : index
    %c0_3 = arith.constant 0 : index
    %3 = vector.load %arg26[%c0_2, %c0_3] : memref<26x4xf32, #tpu.memory_space<vmem>>, vector<26x4xf32>
    tpu.vector_store %arg26[%c0_2, %c0_3], %2 {strides = array<i32>} : memref<26x4xf32, #tpu.memory_space<vmem>>, vector<26x4xf32>,
    %cst_4 = arith.constant 0.000000e+00 : f32
    %4 = vector.broadcast %cst_4 : f32 to vector<14x8xf32>
    %c0_5 = arith.constant 0 : index
    %c0_6 = arith.constant 0 : index
    %5 = vector.load %arg27[%c0_5, %c0_6] : memref<14x8xf32, #tpu.memory_space<vmem>>, vector<14x8xf32>
    tpu.vector_store %arg27[%c0_5, %c0_6], %4 {strides = array<i32>} : memref<14x8xf32, #tpu.memory_space<vmem>>, vector<14x8xf32>,
    %cst_7 = arith.constant 0.000000e+00 : f32
    %6 = vector.broadcast %cst_7 : f32 to vector<8x16xf32>
    %c0_8 = arith.constant 0 : index
    %c0_9 = arith.constant 0 : index
    %7 = vector.load %arg28[%c0_8, %c0_9] : memref<8x16xf32, #tpu.memory_space<vmem>>, vector<8x16xf32>
    tpu.vector_store %arg28[%c0_8, %c0_9], %6 {strides = array<i32>} : memref<8x16xf32, #tpu.memory_space<vmem>>, vector<8x16xf32>,
    %cst_10 = arith.constant 0.000000e+00 : f32
    %8 = vector.broadcast %cst_10 : f32 to vector<4x32xf32>
    %c0_11 = arith.constant 0 : index
    %c0_12 = arith.constant 0 : index
    %9 = vector.load %arg29[%c0_11, %c0_12] : memref<4x32xf32, #tpu.memory_space<vmem>>, vector<4x32xf32>
    tpu.vector_store %arg29[%c0_11, %c0_12], %8 {strides = array<i32>} : memref<4x32xf32, #tpu.memory_space<vmem>>, vector<4x32xf32>,
    %cst_13 = arith.constant 0.000000e+00 : f32
    %10 = vector.broadcast %cst_13 : f32 to vector<4x32xf32>
    %c0_14 = arith.constant 0 : index
    %c0_15 = arith.constant 0 : index
    %11 = vector.load %arg30[%c0_14, %c0_15] : memref<4x32xf32, #tpu.memory_space<vmem>>, vector<4x32xf32>
    tpu.vector_store %arg30[%c0_14, %c0_15], %10 {strides = array<i32>} : memref<4x32xf32, #tpu.memory_space<vmem>>, vector<4x32xf32>,
    %c0_16 = arith.constant 0 : index
    %c0_17 = arith.constant 0 : index
    %c0_18 = arith.constant 0 : index
    %12 = vector.load %arg1[%c0_16, %c0_17, %c0_18] : memref<1x16x4xf32, #tpu.memory_space<vmem>>, vector<1x16x4xf32>
    %13 = vector.shape_cast %12 : vector<1x16x4xf32> to vector<16x4xf32>
    %c7 = arith.constant 7 : index
    %c0_19 = arith.constant 0 : index
    %14 = vector.load %arg25[%c7, %c0_19] : memref<30x4xf32, #tpu.memory_space<vmem>>, vector<16x4xf32>
    tpu.vector_store %arg25[%c7, %c0_19], %13 {strides = array<i32>} : memref<30x4xf32, #tpu.memory_space<vmem>>, vector<16x4xf32>,
    %c0_20 = arith.constant 0 : index
    %c0_21 = arith.constant 0 : index
    %15 = vector.load %arg25[%c0_20, %c0_21] : memref<30x4xf32, #tpu.memory_space<vmem>>, vector<16x4xf32>
    %c0_22 = arith.constant 0 : index
    %c0_23 = arith.constant 0 : index
    %16 = vector.load %arg31[%c0_22, %c0_23] : memref<16x96xf32, #tpu.memory_space<vmem>>, vector<16x4xf32>
    tpu.vector_store %arg31[%c0_22, %c0_23], %15 {strides = array<i32>} : memref<16x96xf32, #tpu.memory_space<vmem>>, vector<16x4xf32>,
    %c1 = arith.constant 1 : index
    %c0_24 = arith.constant 0 : index
    %17 = vector.load %arg25[%c1, %c0_24] : memref<30x4xf32, #tpu.memory_space<vmem>>, vector<16x4xf32>
    %c0_25 = arith.constant 0 : index
    %c4 = arith.constant 4 : index
    %18 = vector.load %arg31[%c0_25, %c4] : memref<16x96xf32, #tpu.memory_space<vmem>>, vector<16x4xf32>
    tpu.vector_store %arg31[%c0_25, %c4], %17 {strides = array<i32>} : memref<16x96xf32, #tpu.memory_space<vmem>>, vector<16x4xf32>,
    %c2 = arith.constant 2 : index
    %c0_26 = arith.constant 0 : index
    %19 = vector.load %arg25[%c2, %c0_26] : memref<30x4xf32, #tpu.memory_space<vmem>>, vector<16x4xf32>
    %c0_27 = arith.constant 0 : index
    %c8 = arith.constant 8 : index
    %20 = vector.load %arg31[%c0_27, %c8] : memref<16x96xf32, #tpu.memory_space<vmem>>, vector<16x4xf32>
    tpu.vector_store %arg31[%c0_27, %c8], %19 {strides = array<i32>} : memref<16x96xf32, #tpu.memory_space<vmem>>, vector<16x4xf32>,
    %c3 = arith.constant 3 : index
    %c0_28 = arith.constant 0 : index
    %21 = vector.load %arg25[%c3, %c0_28] : memref<30x4xf32, #tpu.memory_space<vmem>>, vector<16x4xf32>
    %c0_29 = arith.constant 0 : index
    %c12 = arith.constant 12 : index
    %22 = vector.load %arg31[%c0_29, %c12] : memref<16x96xf32, #tpu.memory_space<vmem>>, vector<16x4xf32>
    tpu.vector_store %arg31[%c0_29, %c12], %21 {strides = array<i32>} : memref<16x96xf32, #tpu.memory_space<vmem>>, vector<16x4xf32>,
    %c4_30 = arith.constant 4 : index
    %c0_31 = arith.constant 0 : index
    %23 = vector.load %arg25[%c4_30, %c0_31] : memref<30x4xf32, #tpu.memory_space<vmem>>, vector<16x4xf32>
    %c0_32 = arith.constant 0 : index
    %c16 = arith.constant 16 : index
    %24 = vector.load %arg31[%c0_32, %c16] : memref<16x96xf32, #tpu.memory_space<vmem>>, vector<16x4xf32>
    tpu.vector_store %arg31[%c0_32, %c16], %23 {strides = array<i32>} : memref<16x96xf32, #tpu.memory_space<vmem>>, vector<16x4xf32>,
    %c5 = arith.constant 5 : index
    %c0_33 = arith.constant 0 : index
    %25 = vector.load %arg25[%c5, %c0_33] : memref<30x4xf32, #tpu.memory_space<vmem>>, vector<16x4xf32>
    %c0_34 = arith.constant 0 : index
    %c20 = arith.constant 20 : index
    %26 = vector.load %arg31[%c0_34, %c20] : memref<16x96xf32, #tpu.memory_space<vmem>>, vector<16x4xf32>
    tpu.vector_store %arg31[%c0_34, %c20], %25 {strides = array<i32>} : memref<16x96xf32, #tpu.memory_space<vmem>>, vector<16x4xf32>,
    %c6 = arith.constant 6 : index
    %c0_35 = arith.constant 0 : index
    %27 = vector.load %arg25[%c6, %c0_35] : memref<30x4xf32, #tpu.memory_space<vmem>>, vector<16x4xf32>
    %c0_36 = arith.constant 0 : index
    %c24 = arith.constant 24 : index
    %28 = vector.load %arg31[%c0_36, %c24] : memref<16x96xf32, #tpu.memory_space<vmem>>, vector<16x4xf32>
    tpu.vector_store %arg31[%c0_36, %c24], %27 {strides = array<i32>} : memref<16x96xf32, #tpu.memory_space<vmem>>, vector<16x4xf32>,
    %c7_37 = arith.constant 7 : index
    %c0_38 = arith.constant 0 : index
    %29 = vector.load %arg25[%c7_37, %c0_38] : memref<30x4xf32, #tpu.memory_space<vmem>>, vector<16x4xf32>
    %c0_39 = arith.constant 0 : index
    %c28 = arith.constant 28 : index
    %30 = vector.load %arg31[%c0_39, %c28] : memref<16x96xf32, #tpu.memory_space<vmem>>, vector<16x4xf32>
    tpu.vector_store %arg31[%c0_39, %c28], %29 {strides = array<i32>} : memref<16x96xf32, #tpu.memory_space<vmem>>, vector<16x4xf32>,
    %c8_40 = arith.constant 8 : index
    %c0_41 = arith.constant 0 : index
    %31 = vector.load %arg25[%c8_40, %c0_41] : memref<30x4xf32, #tpu.memory_space<vmem>>, vector<16x4xf32>
    %c0_42 = arith.constant 0 : index
    %c32 = arith.constant 32 : index
    %32 = vector.load %arg31[%c0_42, %c32] : memref<16x96xf32, #tpu.memory_space<vmem>>, vector<16x4xf32>
    tpu.vector_store %arg31[%c0_42, %c32], %31 {strides = array<i32>} : memref<16x96xf32, #tpu.memory_space<vmem>>, vector<16x4xf32>,
    %c9 = arith.constant 9 : index
    %c0_43 = arith.constant 0 : index
    %33 = vector.load %arg25[%c9, %c0_43] : memref<30x4xf32, #tpu.memory_space<vmem>>, vector<16x4xf32>
    %c0_44 = arith.constant 0 : index
    %c36 = arith.constant 36 : index
    %34 = vector.load %arg31[%c0_44, %c36] : memref<16x96xf32, #tpu.memory_space<vmem>>, vector<16x4xf32>
    tpu.vector_store %arg31[%c0_44, %c36], %33 {strides = array<i32>} : memref<16x96xf32, #tpu.memory_space<vmem>>, vector<16x4xf32>,
    %c10 = arith.constant 10 : index
    %c0_45 = arith.constant 0 : index
    %35 = vector.load %arg25[%c10, %c0_45] : memref<30x4xf32, #tpu.memory_space<vmem>>, vector<16x4xf32>
    %c0_46 = arith.constant 0 : index
    %c40 = arith.constant 40 : index
    %36 = vector.load %arg31[%c0_46, %c40] : memref<16x96xf32, #tpu.memory_space<vmem>>, vector<16x4xf32>
    tpu.vector_store %arg31[%c0_46, %c40], %35 {strides = array<i32>} : memref<16x96xf32, #tpu.memory_space<vmem>>, vector<16x4xf32>,
    %c11 = arith.constant 11 : index
    %c0_47 = arith.constant 0 : index
    %37 = vector.load %arg25[%c11, %c0_47] : memref<30x4xf32, #tpu.memory_space<vmem>>, vector<16x4xf32>
    %c0_48 = arith.constant 0 : index
    %c44 = arith.constant 44 : index
    %38 = vector.load %arg31[%c0_48, %c44] : memref<16x96xf32, #tpu.memory_space<vmem>>, vector<16x4xf32>
    tpu.vector_store %arg31[%c0_48, %c44], %37 {strides = array<i32>} : memref<16x96xf32, #tpu.memory_space<vmem>>, vector<16x4xf32>,
    %c12_49 = arith.constant 12 : index
    %c0_50 = arith.constant 0 : index
    %39 = vector.load %arg25[%c12_49, %c0_50] : memref<30x4xf32, #tpu.memory_space<vmem>>, vector<16x4xf32>
    %c0_51 = arith.constant 0 : index
    %c48 = arith.constant 48 : index
    %40 = vector.load %arg31[%c0_51, %c48] : memref<16x96xf32, #tpu.memory_space<vmem>>, vector<16x4xf32>
    tpu.vector_store %arg31[%c0_51, %c48], %39 {strides = array<i32>} : memref<16x96xf32, #tpu.memory_space<vmem>>, vector<16x4xf32>,
    %c13 = arith.constant 13 : index
    %c0_52 = arith.constant 0 : index
    %41 = vector.load %arg25[%c13, %c0_52] : memref<30x4xf32, #tpu.memory_space<vmem>>, vector<16x4xf32>
    %c0_53 = arith.constant 0 : index
    %c52 = arith.constant 52 : index
    %42 = vector.load %arg31[%c0_53, %c52] : memref<16x96xf32, #tpu.memory_space<vmem>>, vector<16x4xf32>
    tpu.vector_store %arg31[%c0_53, %c52], %41 {strides = array<i32>} : memref<16x96xf32, #tpu.memory_space<vmem>>, vector<16x4xf32>,
    %c14 = arith.constant 14 : index
    %c0_54 = arith.constant 0 : index
    %43 = vector.load %arg25[%c14, %c0_54] : memref<30x4xf32, #tpu.memory_space<vmem>>, vector<16x4xf32>
    %c0_55 = arith.constant 0 : index
    %c56 = arith.constant 56 : index
    %44 = vector.load %arg31[%c0_55, %c56] : memref<16x96xf32, #tpu.memory_space<vmem>>, vector<16x4xf32>
    tpu.vector_store %arg31[%c0_55, %c56], %43 {strides = array<i32>} : memref<16x96xf32, #tpu.memory_space<vmem>>, vector<16x4xf32>,
    %c0_56 = arith.constant 0 : index
    %c0_57 = arith.constant 0 : index
    %45 = vector.load %arg31[%c0_56, %c0_57] : memref<16x96xf32, #tpu.memory_space<vmem>>, vector<16x60xf32>
    %c0_58 = arith.constant 0 : index
    %c0_59 = arith.constant 0 : index
    %46 = vector.load %arg2[%c0_58, %c0_59] : memref<60x4xf32, #tpu.memory_space<vmem>>, vector<60x4xf32>
    %cst_60 = arith.constant dense<0.000000e+00> : vector<16x4xf32>
    %47 = tpu.matmul %45, %46, %cst_60 {dimension_numbers = #tpu.dot_dimension_numbers<[1], [0], [0], [1], [0, 0, 1, 1], [], []>} : vector<16x60xf32>, vector<60x4xf32>, vector<16x4xf32> -> vector<16x4xf32>
    %c0_61 = arith.constant 0 : index
    %c0_62 = arith.constant 0 : index
    %48 = vector.load %arg3[%c0_61, %c0_62] : memref<2x4xf32, #tpu.memory_space<vmem>>, vector<2x4xf32>
    %49 = vector.extract_strided_slice %48 {offsets = [0, 0], sizes = [1, 4], strides = [1, 1]} : vector<2x4xf32> to vector<1x4xf32>
    %50 = vector.broadcast %49 : vector<1x4xf32> to vector<16x4xf32>
    %51 = arith.mulf %47, %50 : vector<16x4xf32>
    %52 = vector.extract_strided_slice %48 {offsets = [1, 0], sizes = [1, 4], strides = [1, 1]} : vector<2x4xf32> to vector<1x4xf32>
    %53 = vector.broadcast %52 : vector<1x4xf32> to vector<16x4xf32>
    %54 = arith.addf %51, %53 : vector<16x4xf32>
    %cst_63 = arith.constant 0.000000e+00 : f32
    %55 = vector.broadcast %cst_63 : f32 to vector<16x4xf32>
    %56 = arith.maximumf %54, %55 : vector<16x4xf32>
    %c5_64 = arith.constant 5 : index
    %c0_65 = arith.constant 0 : index
    %57 = vector.load %arg26[%c5_64, %c0_65] : memref<26x4xf32, #tpu.memory_space<vmem>>, vector<16x4xf32>
    tpu.vector_store %arg26[%c5_64, %c0_65], %56 {strides = array<i32>} : memref<26x4xf32, #tpu.memory_space<vmem>>, vector<16x4xf32>,
    %c0_66 = arith.constant 0 : index
    %c0_67 = arith.constant 0 : index
    %58 = tpu.strided_load %arg26[%c0_66, %c0_67] {strides = array<i32: 2, 1>} : memref<26x4xf32, #tpu.memory_space<vmem>>, vector<8x4xf32>
    %c0_68 = arith.constant 0 : index
    %c0_69 = arith.constant 0 : index
    %59 = vector.load %arg31[%c0_68, %c0_69] : memref<16x96xf32, #tpu.memory_space<vmem>>, vector<8x4xf32>
    tpu.vector_store %arg31[%c0_68, %c0_69], %58 {strides = array<i32>} : memref<16x96xf32, #tpu.memory_space<vmem>>, vector<8x4xf32>,
    %c1_70 = arith.constant 1 : index
    %c0_71 = arith.constant 0 : index
    %60 = tpu.strided_load %arg26[%c1_70, %c0_71] {strides = array<i32: 2, 1>} : memref<26x4xf32, #tpu.memory_space<vmem>>, vector<8x4xf32>
    %c0_72 = arith.constant 0 : index
    %c4_73 = arith.constant 4 : index
    %61 = vector.load %arg31[%c0_72, %c4_73] : memref<16x96xf32, #tpu.memory_space<vmem>>, vector<8x4xf32>
    tpu.vector_store %arg31[%c0_72, %c4_73], %60 {strides = array<i32>} : memref<16x96xf32, #tpu.memory_space<vmem>>, vector<8x4xf32>,
    %c2_74 = arith.constant 2 : index
    %c0_75 = arith.constant 0 : index
    %62 = tpu.strided_load %arg26[%c2_74, %c0_75] {strides = array<i32: 2, 1>} : memref<26x4xf32, #tpu.memory_space<vmem>>, vector<8x4xf32>
    %c0_76 = arith.constant 0 : index
    %c8_77 = arith.constant 8 : index
    %63 = vector.load %arg31[%c0_76, %c8_77] : memref<16x96xf32, #tpu.memory_space<vmem>>, vector<8x4xf32>
    tpu.vector_store %arg31[%c0_76, %c8_77], %62 {strides = array<i32>} : memref<16x96xf32, #tpu.memory_space<vmem>>, vector<8x4xf32>,
    %c3_78 = arith.constant 3 : index
    %c0_79 = arith.constant 0 : index
    %64 = tpu.strided_load %arg26[%c3_78, %c0_79] {strides = array<i32: 2, 1>} : memref<26x4xf32, #tpu.memory_space<vmem>>, vector<8x4xf32>
    %c0_80 = arith.constant 0 : index
    %c12_81 = arith.constant 12 : index
    %65 = vector.load %arg31[%c0_80, %c12_81] : memref<16x96xf32, #tpu.memory_space<vmem>>, vector<8x4xf32>
    tpu.vector_store %arg31[%c0_80, %c12_81], %64 {strides = array<i32>} : memref<16x96xf32, #tpu.memory_space<vmem>>, vector<8x4xf32>,
    %c4_82 = arith.constant 4 : index
    %c0_83 = arith.constant 0 : index
    %66 = tpu.strided_load %arg26[%c4_82, %c0_83] {strides = array<i32: 2, 1>} : memref<26x4xf32, #tpu.memory_space<vmem>>, vector<8x4xf32>
    %c0_84 = arith.constant 0 : index
    %c16_85 = arith.constant 16 : index
    %67 = vector.load %arg31[%c0_84, %c16_85] : memref<16x96xf32, #tpu.memory_space<vmem>>, vector<8x4xf32>
    tpu.vector_store %arg31[%c0_84, %c16_85], %66 {strides = array<i32>} : memref<16x96xf32, #tpu.memory_space<vmem>>, vector<8x4xf32>,
    %c5_86 = arith.constant 5 : index
    %c0_87 = arith.constant 0 : index
    %68 = tpu.strided_load %arg26[%c5_86, %c0_87] {strides = array<i32: 2, 1>} : memref<26x4xf32, #tpu.memory_space<vmem>>, vector<8x4xf32>
    %c0_88 = arith.constant 0 : index
    %c20_89 = arith.constant 20 : index
    %69 = vector.load %arg31[%c0_88, %c20_89] : memref<16x96xf32, #tpu.memory_space<vmem>>, vector<8x4xf32>
    tpu.vector_store %arg31[%c0_88, %c20_89], %68 {strides = array<i32>} : memref<16x96xf32, #tpu.memory_space<vmem>>, vector<8x4xf32>,
    %c6_90 = arith.constant 6 : index
    %c0_91 = arith.constant 0 : index
    %70 = tpu.strided_load %arg26[%c6_90, %c0_91] {strides = array<i32: 2, 1>} : memref<26x4xf32, #tpu.memory_space<vmem>>, vector<8x4xf32>
    %c0_92 = arith.constant 0 : index
    %c24_93 = arith.constant 24 : index
    %71 = vector.load %arg31[%c0_92, %c24_93] : memref<16x96xf32, #tpu.memory_space<vmem>>, vector<8x4xf32>
    tpu.vector_store %arg31[%c0_92, %c24_93], %70 {strides = array<i32>} : memref<16x96xf32, #tpu.memory_space<vmem>>, vector<8x4xf32>,
    %c7_94 = arith.constant 7 : index
    %c0_95 = arith.constant 0 : index
    %72 = tpu.strided_load %arg26[%c7_94, %c0_95] {strides = array<i32: 2, 1>} : memref<26x4xf32, #tpu.memory_space<vmem>>, vector<8x4xf32>
    %c0_96 = arith.constant 0 : index
    %c28_97 = arith.constant 28 : index
    %73 = vector.load %arg31[%c0_96, %c28_97] : memref<16x96xf32, #tpu.memory_space<vmem>>, vector<8x4xf32>
    tpu.vector_store %arg31[%c0_96, %c28_97], %72 {strides = array<i32>} : memref<16x96xf32, #tpu.memory_space<vmem>>, vector<8x4xf32>,
    %c8_98 = arith.constant 8 : index
    %c0_99 = arith.constant 0 : index
    %74 = tpu.strided_load %arg26[%c8_98, %c0_99] {strides = array<i32: 2, 1>} : memref<26x4xf32, #tpu.memory_space<vmem>>, vector<8x4xf32>
    %c0_100 = arith.constant 0 : index
    %c32_101 = arith.constant 32 : index
    %75 = vector.load %arg31[%c0_100, %c32_101] : memref<16x96xf32, #tpu.memory_space<vmem>>, vector<8x4xf32>
    tpu.vector_store %arg31[%c0_100, %c32_101], %74 {strides = array<i32>} : memref<16x96xf32, #tpu.memory_space<vmem>>, vector<8x4xf32>,
    %c9_102 = arith.constant 9 : index
    %c0_103 = arith.constant 0 : index
    %76 = tpu.strided_load %arg26[%c9_102, %c0_103] {strides = array<i32: 2, 1>} : memref<26x4xf32, #tpu.memory_space<vmem>>, vector<8x4xf32>
    %c0_104 = arith.constant 0 : index
    %c36_105 = arith.constant 36 : index
    %77 = vector.load %arg31[%c0_104, %c36_105] : memref<16x96xf32, #tpu.memory_space<vmem>>, vector<8x4xf32>
    tpu.vector_store %arg31[%c0_104, %c36_105], %76 {strides = array<i32>} : memref<16x96xf32, #tpu.memory_space<vmem>>, vector<8x4xf32>,
    %c10_106 = arith.constant 10 : index
    %c0_107 = arith.constant 0 : index
    %78 = tpu.strided_load %arg26[%c10_106, %c0_107] {strides = array<i32: 2, 1>} : memref<26x4xf32, #tpu.memory_space<vmem>>, vector<8x4xf32>
    %c0_108 = arith.constant 0 : index
    %c40_109 = arith.constant 40 : index
    %79 = vector.load %arg31[%c0_108, %c40_109] : memref<16x96xf32, #tpu.memory_space<vmem>>, vector<8x4xf32>
    tpu.vector_store %arg31[%c0_108, %c40_109], %78 {strides = array<i32>} : memref<16x96xf32, #tpu.memory_space<vmem>>, vector<8x4xf32>,
    %c0_110 = arith.constant 0 : index
    %c0_111 = arith.constant 0 : index
    %80 = vector.load %arg31[%c0_110, %c0_111] : memref<16x96xf32, #tpu.memory_space<vmem>>, vector<8x44xf32>
    %c0_112 = arith.constant 0 : index
    %c0_113 = arith.constant 0 : index
    %81 = vector.load %arg4[%c0_112, %c0_113] : memref<44x8xf32, #tpu.memory_space<vmem>>, vector<44x8xf32>
    %cst_114 = arith.constant dense<0.000000e+00> : vector<8x8xf32>
    %82 = tpu.matmul %80, %81, %cst_114 {dimension_numbers = #tpu.dot_dimension_numbers<[1], [0], [0], [1], [0, 0, 1, 1], [], []>} : vector<8x44xf32>, vector<44x8xf32>, vector<8x8xf32> -> vector<8x8xf32>
    %c0_115 = arith.constant 0 : index
    %c0_116 = arith.constant 0 : index
    %83 = vector.load %arg5[%c0_115, %c0_116] : memref<2x8xf32, #tpu.memory_space<vmem>>, vector<2x8xf32>
    %84 = vector.extract_strided_slice %83 {offsets = [0, 0], sizes = [1, 8], strides = [1, 1]} : vector<2x8xf32> to vector<1x8xf32>
    %85 = vector.broadcast %84 : vector<1x8xf32> to vector<8x8xf32>
    %86 = arith.mulf %82, %85 : vector<8x8xf32>
    %87 = vector.extract_strided_slice %83 {offsets = [1, 0], sizes = [1, 8], strides = [1, 1]} : vector<2x8xf32> to vector<1x8xf32>
    %88 = vector.broadcast %87 : vector<1x8xf32> to vector<8x8xf32>
    %89 = arith.addf %86, %88 : vector<8x8xf32>
    %cst_117 = arith.constant 0.000000e+00 : f32
    %90 = vector.broadcast %cst_117 : f32 to vector<8x8xf32>
    %91 = arith.maximumf %89, %90 : vector<8x8xf32>
    %c3_118 = arith.constant 3 : index
    %c0_119 = arith.constant 0 : index
    %92 = vector.load %arg27[%c3_118, %c0_119] : memref<14x8xf32, #tpu.memory_space<vmem>>, vector<8x8xf32>
    tpu.vector_store %arg27[%c3_118, %c0_119], %91 {strides = array<i32>} : memref<14x8xf32, #tpu.memory_space<vmem>>, vector<8x8xf32>,
    %c0_120 = arith.constant 0 : index
    %c0_121 = arith.constant 0 : index
    %93 = tpu.strided_load %arg27[%c0_120, %c0_121] {strides = array<i32: 2, 1>} : memref<14x8xf32, #tpu.memory_space<vmem>>, vector<4x8xf32>
    %c0_122 = arith.constant 0 : index
    %c0_123 = arith.constant 0 : index
    %94 = vector.load %arg31[%c0_122, %c0_123] : memref<16x96xf32, #tpu.memory_space<vmem>>, vector<4x8xf32>
    tpu.vector_store %arg31[%c0_122, %c0_123], %93 {strides = array<i32>} : memref<16x96xf32, #tpu.memory_space<vmem>>, vector<4x8xf32>,
    %c1_124 = arith.constant 1 : index
    %c0_125 = arith.constant 0 : index
    %95 = tpu.strided_load %arg27[%c1_124, %c0_125] {strides = array<i32: 2, 1>} : memref<14x8xf32, #tpu.memory_space<vmem>>, vector<4x8xf32>
    %c0_126 = arith.constant 0 : index
    %c8_127 = arith.constant 8 : index
    %96 = vector.load %arg31[%c0_126, %c8_127] : memref<16x96xf32, #tpu.memory_space<vmem>>, vector<4x8xf32>
    tpu.vector_store %arg31[%c0_126, %c8_127], %95 {strides = array<i32>} : memref<16x96xf32, #tpu.memory_space<vmem>>, vector<4x8xf32>,
    %c2_128 = arith.constant 2 : index
    %c0_129 = arith.constant 0 : index
    %97 = tpu.strided_load %arg27[%c2_128, %c0_129] {strides = array<i32: 2, 1>} : memref<14x8xf32, #tpu.memory_space<vmem>>, vector<4x8xf32>
    %c0_130 = arith.constant 0 : index
    %c16_131 = arith.constant 16 : index
    %98 = vector.load %arg31[%c0_130, %c16_131] : memref<16x96xf32, #tpu.memory_space<vmem>>, vector<4x8xf32>
    tpu.vector_store %arg31[%c0_130, %c16_131], %97 {strides = array<i32>} : memref<16x96xf32, #tpu.memory_space<vmem>>, vector<4x8xf32>,
    %c3_132 = arith.constant 3 : index
    %c0_133 = arith.constant 0 : index
    %99 = tpu.strided_load %arg27[%c3_132, %c0_133] {strides = array<i32: 2, 1>} : memref<14x8xf32, #tpu.memory_space<vmem>>, vector<4x8xf32>
    %c0_134 = arith.constant 0 : index
    %c24_135 = arith.constant 24 : index
    %100 = vector.load %arg31[%c0_134, %c24_135] : memref<16x96xf32, #tpu.memory_space<vmem>>, vector<4x8xf32>
    tpu.vector_store %arg31[%c0_134, %c24_135], %99 {strides = array<i32>} : memref<16x96xf32, #tpu.memory_space<vmem>>, vector<4x8xf32>,
    %c4_136 = arith.constant 4 : index
    %c0_137 = arith.constant 0 : index
    %101 = tpu.strided_load %arg27[%c4_136, %c0_137] {strides = array<i32: 2, 1>} : memref<14x8xf32, #tpu.memory_space<vmem>>, vector<4x8xf32>
    %c0_138 = arith.constant 0 : index
    %c32_139 = arith.constant 32 : index
    %102 = vector.load %arg31[%c0_138, %c32_139] : memref<16x96xf32, #tpu.memory_space<vmem>>, vector<4x8xf32>
    tpu.vector_store %arg31[%c0_138, %c32_139], %101 {strides = array<i32>} : memref<16x96xf32, #tpu.memory_space<vmem>>, vector<4x8xf32>,
    %c5_140 = arith.constant 5 : index
    %c0_141 = arith.constant 0 : index
    %103 = tpu.strided_load %arg27[%c5_140, %c0_141] {strides = array<i32: 2, 1>} : memref<14x8xf32, #tpu.memory_space<vmem>>, vector<4x8xf32>
    %c0_142 = arith.constant 0 : index
    %c40_143 = arith.constant 40 : index
    %104 = vector.load %arg31[%c0_142, %c40_143] : memref<16x96xf32, #tpu.memory_space<vmem>>, vector<4x8xf32>
    tpu.vector_store %arg31[%c0_142, %c40_143], %103 {strides = array<i32>} : memref<16x96xf32, #tpu.memory_space<vmem>>, vector<4x8xf32>,
    %c6_144 = arith.constant 6 : index
    %c0_145 = arith.constant 0 : index
    %105 = tpu.strided_load %arg27[%c6_144, %c0_145] {strides = array<i32: 2, 1>} : memref<14x8xf32, #tpu.memory_space<vmem>>, vector<4x8xf32>
    %c0_146 = arith.constant 0 : index
    %c48_147 = arith.constant 48 : index
    %106 = vector.load %arg31[%c0_146, %c48_147] : memref<16x96xf32, #tpu.memory_space<vmem>>, vector<4x8xf32>
    tpu.vector_store %arg31[%c0_146, %c48_147], %105 {strides = array<i32>} : memref<16x96xf32, #tpu.memory_space<vmem>>, vector<4x8xf32>,
    %c0_148 = arith.constant 0 : index
    %c0_149 = arith.constant 0 : index
    %107 = vector.load %arg31[%c0_148, %c0_149] : memref<16x96xf32, #tpu.memory_space<vmem>>, vector<4x56xf32>
    %c0_150 = arith.constant 0 : index
    %c0_151 = arith.constant 0 : index
    %108 = vector.load %arg6[%c0_150, %c0_151] : memref<56x16xf32, #tpu.memory_space<vmem>>, vector<56x16xf32>
    %cst_152 = arith.constant dense<0.000000e+00> : vector<4x16xf32>
    %109 = tpu.matmul %107, %108, %cst_152 {dimension_numbers = #tpu.dot_dimension_numbers<[1], [0], [0], [1], [0, 0, 1, 1], [], []>} : vector<4x56xf32>, vector<56x16xf32>, vector<4x16xf32> -> vector<4x16xf32>
    %c0_153 = arith.constant 0 : index
    %c0_154 = arith.constant 0 : index
    %110 = vector.load %arg7[%c0_153, %c0_154] : memref<2x16xf32, #tpu.memory_space<vmem>>, vector<2x16xf32>
    %111 = vector.extract_strided_slice %110 {offsets = [0, 0], sizes = [1, 16], strides = [1, 1]} : vector<2x16xf32> to vector<1x16xf32>
    %112 = vector.broadcast %111 : vector<1x16xf32> to vector<4x16xf32>
    %113 = arith.mulf %109, %112 : vector<4x16xf32>
    %114 = vector.extract_strided_slice %110 {offsets = [1, 0], sizes = [1, 16], strides = [1, 1]} : vector<2x16xf32> to vector<1x16xf32>
    %115 = vector.broadcast %114 : vector<1x16xf32> to vector<4x16xf32>
    %116 = arith.addf %113, %115 : vector<4x16xf32>
    %cst_155 = arith.constant 0.000000e+00 : f32
    %117 = vector.broadcast %cst_155 : f32 to vector<4x16xf32>
    %118 = arith.maximumf %116, %117 : vector<4x16xf32>
    %c2_156 = arith.constant 2 : index
    %c0_157 = arith.constant 0 : index
    %119 = vector.load %arg28[%c2_156, %c0_157] : memref<8x16xf32, #tpu.memory_space<vmem>>, vector<4x16xf32>
    tpu.vector_store %arg28[%c2_156, %c0_157], %118 {strides = array<i32>} : memref<8x16xf32, #tpu.memory_space<vmem>>, vector<4x16xf32>,
    %c0_158 = arith.constant 0 : index
    %c0_159 = arith.constant 0 : index
    %120 = tpu.strided_load %arg28[%c0_158, %c0_159] {strides = array<i32: 2, 1>} : memref<8x16xf32, #tpu.memory_space<vmem>>, vector<2x16xf32>
    %c0_160 = arith.constant 0 : index
    %c0_161 = arith.constant 0 : index
    %121 = vector.load %arg31[%c0_160, %c0_161] : memref<16x96xf32, #tpu.memory_space<vmem>>, vector<2x16xf32>
    tpu.vector_store %arg31[%c0_160, %c0_161], %120 {strides = array<i32>} : memref<16x96xf32, #tpu.memory_space<vmem>>, vector<2x16xf32>,
    %c1_162 = arith.constant 1 : index
    %c0_163 = arith.constant 0 : index
    %122 = tpu.strided_load %arg28[%c1_162, %c0_163] {strides = array<i32: 2, 1>} : memref<8x16xf32, #tpu.memory_space<vmem>>, vector<2x16xf32>
    %c0_164 = arith.constant 0 : index
    %c16_165 = arith.constant 16 : index
    %123 = vector.load %arg31[%c0_164, %c16_165] : memref<16x96xf32, #tpu.memory_space<vmem>>, vector<2x16xf32>
    tpu.vector_store %arg31[%c0_164, %c16_165], %122 {strides = array<i32>} : memref<16x96xf32, #tpu.memory_space<vmem>>, vector<2x16xf32>,
    %c2_166 = arith.constant 2 : index
    %c0_167 = arith.constant 0 : index
    %124 = tpu.strided_load %arg28[%c2_166, %c0_167] {strides = array<i32: 2, 1>} : memref<8x16xf32, #tpu.memory_space<vmem>>, vector<2x16xf32>
    %c0_168 = arith.constant 0 : index
    %c32_169 = arith.constant 32 : index
    %125 = vector.load %arg31[%c0_168, %c32_169] : memref<16x96xf32, #tpu.memory_space<vmem>>, vector<2x16xf32>
    tpu.vector_store %arg31[%c0_168, %c32_169], %124 {strides = array<i32>} : memref<16x96xf32, #tpu.memory_space<vmem>>, vector<2x16xf32>,
    %c3_170 = arith.constant 3 : index
    %c0_171 = arith.constant 0 : index
    %126 = tpu.strided_load %arg28[%c3_170, %c0_171] {strides = array<i32: 2, 1>} : memref<8x16xf32, #tpu.memory_space<vmem>>, vector<2x16xf32>
    %c0_172 = arith.constant 0 : index
    %c48_173 = arith.constant 48 : index
    %127 = vector.load %arg31[%c0_172, %c48_173] : memref<16x96xf32, #tpu.memory_space<vmem>>, vector<2x16xf32>
    tpu.vector_store %arg31[%c0_172, %c48_173], %126 {strides = array<i32>} : memref<16x96xf32, #tpu.memory_space<vmem>>, vector<2x16xf32>,
    %c4_174 = arith.constant 4 : index
    %c0_175 = arith.constant 0 : index
    %128 = tpu.strided_load %arg28[%c4_174, %c0_175] {strides = array<i32: 2, 1>} : memref<8x16xf32, #tpu.memory_space<vmem>>, vector<2x16xf32>
    %c0_176 = arith.constant 0 : index
    %c64 = arith.constant 64 : index
    %129 = vector.load %arg31[%c0_176, %c64] : memref<16x96xf32, #tpu.memory_space<vmem>>, vector<2x16xf32>
    tpu.vector_store %arg31[%c0_176, %c64], %128 {strides = array<i32>} : memref<16x96xf32, #tpu.memory_space<vmem>>, vector<2x16xf32>,
    %c0_177 = arith.constant 0 : index
    %c0_178 = arith.constant 0 : index
    %130 = vector.load %arg31[%c0_177, %c0_178] : memref<16x96xf32, #tpu.memory_space<vmem>>, vector<2x80xf32>
    %c0_179 = arith.constant 0 : index
    %c0_180 = arith.constant 0 : index
    %131 = vector.load %arg8[%c0_179, %c0_180] : memref<80x32xf32, #tpu.memory_space<vmem>>, vector<80x32xf32>
    %cst_181 = arith.constant dense<0.000000e+00> : vector<2x32xf32>
    %132 = tpu.matmul %130, %131, %cst_181 {dimension_numbers = #tpu.dot_dimension_numbers<[1], [0], [0], [1], [0, 0, 1, 1], [], []>} : vector<2x80xf32>, vector<80x32xf32>, vector<2x32xf32> -> vector<2x32xf32>
    %c0_182 = arith.constant 0 : index
    %c0_183 = arith.constant 0 : index
    %133 = vector.load %arg9[%c0_182, %c0_183] : memref<2x32xf32, #tpu.memory_space<vmem>>, vector<2x32xf32>
    %134 = vector.extract_strided_slice %133 {offsets = [0, 0], sizes = [1, 32], strides = [1, 1]} : vector<2x32xf32> to vector<1x32xf32>
    %135 = vector.broadcast %134 : vector<1x32xf32> to vector<2x32xf32>
    %136 = arith.mulf %132, %135 : vector<2x32xf32>
    %137 = vector.extract_strided_slice %133 {offsets = [1, 0], sizes = [1, 32], strides = [1, 1]} : vector<2x32xf32> to vector<1x32xf32>
    %138 = vector.broadcast %137 : vector<1x32xf32> to vector<2x32xf32>
    %139 = arith.addf %136, %138 : vector<2x32xf32>
    %cst_184 = arith.constant 0.000000e+00 : f32
    %140 = vector.broadcast %cst_184 : f32 to vector<2x32xf32>
    %141 = arith.maximumf %139, %140 : vector<2x32xf32>
    %c1_185 = arith.constant 1 : index
    %c0_186 = arith.constant 0 : index
    %142 = vector.load %arg29[%c1_185, %c0_186] : memref<4x32xf32, #tpu.memory_space<vmem>>, vector<2x32xf32>
    tpu.vector_store %arg29[%c1_185, %c0_186], %141 {strides = array<i32>} : memref<4x32xf32, #tpu.memory_space<vmem>>, vector<2x32xf32>,
    %c0_187 = arith.constant 0 : index
    %c0_188 = arith.constant 0 : index
    %143 = vector.load %arg29[%c0_187, %c0_188] : memref<4x32xf32, #tpu.memory_space<vmem>>, vector<2x32xf32>
    %c0_189 = arith.constant 0 : index
    %c0_190 = arith.constant 0 : index
    %144 = vector.load %arg31[%c0_189, %c0_190] : memref<16x96xf32, #tpu.memory_space<vmem>>, vector<2x32xf32>
    tpu.vector_store %arg31[%c0_189, %c0_190], %143 {strides = array<i32>} : memref<16x96xf32, #tpu.memory_space<vmem>>, vector<2x32xf32>,
    %c1_191 = arith.constant 1 : index
    %c0_192 = arith.constant 0 : index
    %145 = vector.load %arg29[%c1_191, %c0_192] : memref<4x32xf32, #tpu.memory_space<vmem>>, vector<2x32xf32>
    %c0_193 = arith.constant 0 : index
    %c32_194 = arith.constant 32 : index
    %146 = vector.load %arg31[%c0_193, %c32_194] : memref<16x96xf32, #tpu.memory_space<vmem>>, vector<2x32xf32>
    tpu.vector_store %arg31[%c0_193, %c32_194], %145 {strides = array<i32>} : memref<16x96xf32, #tpu.memory_space<vmem>>, vector<2x32xf32>,
    %c2_195 = arith.constant 2 : index
    %c0_196 = arith.constant 0 : index
    %147 = vector.load %arg29[%c2_195, %c0_196] : memref<4x32xf32, #tpu.memory_space<vmem>>, vector<2x32xf32>
    %c0_197 = arith.constant 0 : index
    %c64_198 = arith.constant 64 : index
    %148 = vector.load %arg31[%c0_197, %c64_198] : memref<16x96xf32, #tpu.memory_space<vmem>>, vector<2x32xf32>
    tpu.vector_store %arg31[%c0_197, %c64_198], %147 {strides = array<i32>} : memref<16x96xf32, #tpu.memory_space<vmem>>, vector<2x32xf32>,
    %c0_199 = arith.constant 0 : index
    %c0_200 = arith.constant 0 : index
    %149 = vector.load %arg31[%c0_199, %c0_200] : memref<16x96xf32, #tpu.memory_space<vmem>>, vector<2x96xf32>
    %c0_201 = arith.constant 0 : index
    %c0_202 = arith.constant 0 : index
    %150 = vector.load %arg10[%c0_201, %c0_202] : memref<96x32xf32, #tpu.memory_space<vmem>>, vector<96x32xf32>
    %cst_203 = arith.constant dense<0.000000e+00> : vector<2x32xf32>
    %151 = tpu.matmul %149, %150, %cst_203 {dimension_numbers = #tpu.dot_dimension_numbers<[1], [0], [0], [1], [0, 0, 1, 1], [], []>} : vector<2x96xf32>, vector<96x32xf32>, vector<2x32xf32> -> vector<2x32xf32>
    %c0_204 = arith.constant 0 : index
    %c0_205 = arith.constant 0 : index
    %152 = vector.load %arg11[%c0_204, %c0_205] : memref<2x32xf32, #tpu.memory_space<vmem>>, vector<2x32xf32>
    %153 = vector.extract_strided_slice %152 {offsets = [0, 0], sizes = [1, 32], strides = [1, 1]} : vector<2x32xf32> to vector<1x32xf32>
    %154 = vector.broadcast %153 : vector<1x32xf32> to vector<2x32xf32>
    %155 = arith.mulf %151, %154 : vector<2x32xf32>
    %156 = vector.extract_strided_slice %152 {offsets = [1, 0], sizes = [1, 32], strides = [1, 1]} : vector<2x32xf32> to vector<1x32xf32>
    %157 = vector.broadcast %156 : vector<1x32xf32> to vector<2x32xf32>
    %158 = arith.addf %155, %157 : vector<2x32xf32>
    %cst_206 = arith.constant 0.000000e+00 : f32
    %159 = vector.broadcast %cst_206 : f32 to vector<2x32xf32>
    %160 = arith.maximumf %158, %159 : vector<2x32xf32>
    %c1_207 = arith.constant 1 : index
    %c0_208 = arith.constant 0 : index
    %161 = vector.load %arg30[%c1_207, %c0_208] : memref<4x32xf32, #tpu.memory_space<vmem>>, vector<2x32xf32>
    tpu.vector_store %arg30[%c1_207, %c0_208], %160 {strides = array<i32>} : memref<4x32xf32, #tpu.memory_space<vmem>>, vector<2x32xf32>,
    %c1_209 = arith.constant 1 : index
    %c0_210 = arith.constant 0 : index
    %162 = vector.load %arg29[%c1_209, %c0_210] : memref<4x32xf32, #tpu.memory_space<vmem>>, vector<2x32xf32>
    %c0_211 = arith.constant 0 : index
    %c0_212 = arith.constant 0 : index
    %163 = vector.load %arg30[%c0_211, %c0_212] : memref<4x32xf32, #tpu.memory_space<vmem>>, vector<2x32xf32>
    %c0_213 = arith.constant 0 : index
    %c0_214 = arith.constant 0 : index
    %164 = vector.load %arg31[%c0_213, %c0_214] : memref<16x96xf32, #tpu.memory_space<vmem>>, vector<2x32xf32>
    tpu.vector_store %arg31[%c0_213, %c0_214], %163 {strides = array<i32>} : memref<16x96xf32, #tpu.memory_space<vmem>>, vector<2x32xf32>,
    %c1_215 = arith.constant 1 : index
    %c0_216 = arith.constant 0 : index
    %165 = vector.load %arg30[%c1_215, %c0_216] : memref<4x32xf32, #tpu.memory_space<vmem>>, vector<2x32xf32>
    %c0_217 = arith.constant 0 : index
    %c32_218 = arith.constant 32 : index
    %166 = vector.load %arg31[%c0_217, %c32_218] : memref<16x96xf32, #tpu.memory_space<vmem>>, vector<2x32xf32>
    tpu.vector_store %arg31[%c0_217, %c32_218], %165 {strides = array<i32>} : memref<16x96xf32, #tpu.memory_space<vmem>>, vector<2x32xf32>,
    %c2_219 = arith.constant 2 : index
    %c0_220 = arith.constant 0 : index
    %167 = vector.load %arg30[%c2_219, %c0_220] : memref<4x32xf32, #tpu.memory_space<vmem>>, vector<2x32xf32>
    %c0_221 = arith.constant 0 : index
    %c64_222 = arith.constant 64 : index
    %168 = vector.load %arg31[%c0_221, %c64_222] : memref<16x96xf32, #tpu.memory_space<vmem>>, vector<2x32xf32>
    tpu.vector_store %arg31[%c0_221, %c64_222], %167 {strides = array<i32>} : memref<16x96xf32, #tpu.memory_space<vmem>>, vector<2x32xf32>,
    %c0_223 = arith.constant 0 : index
    %c0_224 = arith.constant 0 : index
    %169 = vector.load %arg31[%c0_223, %c0_224] : memref<16x96xf32, #tpu.memory_space<vmem>>, vector<2x96xf32>
    %c0_225 = arith.constant 0 : index
    %c0_226 = arith.constant 0 : index
    %170 = vector.load %arg12[%c0_225, %c0_226] : memref<96x32xf32, #tpu.memory_space<vmem>>, vector<96x32xf32>
    %cst_227 = arith.constant dense<0.000000e+00> : vector<2x32xf32>
    %171 = tpu.matmul %169, %170, %cst_227 {dimension_numbers = #tpu.dot_dimension_numbers<[1], [0], [0], [1], [0, 0, 1, 1], [], []>} : vector<2x96xf32>, vector<96x32xf32>, vector<2x32xf32> -> vector<2x32xf32>
    %c0_228 = arith.constant 0 : index
    %c0_229 = arith.constant 0 : index
    %172 = vector.load %arg13[%c0_228, %c0_229] : memref<2x32xf32, #tpu.memory_space<vmem>>, vector<2x32xf32>
    %173 = vector.extract_strided_slice %172 {offsets = [0, 0], sizes = [1, 32], strides = [1, 1]} : vector<2x32xf32> to vector<1x32xf32>
    %174 = vector.broadcast %173 : vector<1x32xf32> to vector<2x32xf32>
    %175 = arith.mulf %171, %174 : vector<2x32xf32>
    %176 = vector.extract_strided_slice %172 {offsets = [1, 0], sizes = [1, 32], strides = [1, 1]} : vector<2x32xf32> to vector<1x32xf32>
    %177 = vector.broadcast %176 : vector<1x32xf32> to vector<2x32xf32>
    %178 = arith.addf %175, %177 : vector<2x32xf32>
    %179 = arith.addf %178, %162 : vector<2x32xf32>
    %cst_230 = arith.constant 0.000000e+00 : f32
    %180 = vector.broadcast %cst_230 : f32 to vector<2x32xf32>
    %181 = arith.maximumf %179, %180 : vector<2x32xf32>
    %c1_231 = arith.constant 1 : index
    %c0_232 = arith.constant 0 : index
    %182 = vector.load %arg29[%c1_231, %c0_232] : memref<4x32xf32, #tpu.memory_space<vmem>>, vector<2x32xf32>
    tpu.vector_store %arg29[%c1_231, %c0_232], %181 {strides = array<i32>} : memref<4x32xf32, #tpu.memory_space<vmem>>, vector<2x32xf32>,
    %c0_233 = arith.constant 0 : index
    %c0_234 = arith.constant 0 : index
    %183 = vector.load %arg29[%c0_233, %c0_234] : memref<4x32xf32, #tpu.memory_space<vmem>>, vector<2x32xf32>
    %c0_235 = arith.constant 0 : index
    %c0_236 = arith.constant 0 : index
    %184 = vector.load %arg31[%c0_235, %c0_236] : memref<16x96xf32, #tpu.memory_space<vmem>>, vector<2x32xf32>
    tpu.vector_store %arg31[%c0_235, %c0_236], %183 {strides = array<i32>} : memref<16x96xf32, #tpu.memory_space<vmem>>, vector<2x32xf32>,
    %c1_237 = arith.constant 1 : index
    %c0_238 = arith.constant 0 : index
    %185 = vector.load %arg29[%c1_237, %c0_238] : memref<4x32xf32, #tpu.memory_space<vmem>>, vector<2x32xf32>
    %c0_239 = arith.constant 0 : index
    %c32_240 = arith.constant 32 : index
    %186 = vector.load %arg31[%c0_239, %c32_240] : memref<16x96xf32, #tpu.memory_space<vmem>>, vector<2x32xf32>
    tpu.vector_store %arg31[%c0_239, %c32_240], %185 {strides = array<i32>} : memref<16x96xf32, #tpu.memory_space<vmem>>, vector<2x32xf32>,
    %c2_241 = arith.constant 2 : index
    %c0_242 = arith.constant 0 : index
    %187 = vector.load %arg29[%c2_241, %c0_242] : memref<4x32xf32, #tpu.memory_space<vmem>>, vector<2x32xf32>
    %c0_243 = arith.constant 0 : index
    %c64_244 = arith.constant 64 : index
    %188 = vector.load %arg31[%c0_243, %c64_244] : memref<16x96xf32, #tpu.memory_space<vmem>>, vector<2x32xf32>
    tpu.vector_store %arg31[%c0_243, %c64_244], %187 {strides = array<i32>} : memref<16x96xf32, #tpu.memory_space<vmem>>, vector<2x32xf32>,
    %c0_245 = arith.constant 0 : index
    %c0_246 = arith.constant 0 : index
    %189 = vector.load %arg31[%c0_245, %c0_246] : memref<16x96xf32, #tpu.memory_space<vmem>>, vector<2x96xf32>
    %c0_247 = arith.constant 0 : index
    %c0_248 = arith.constant 0 : index
    %190 = vector.load %arg14[%c0_247, %c0_248] : memref<96x32xf32, #tpu.memory_space<vmem>>, vector<96x32xf32>
    %cst_249 = arith.constant dense<0.000000e+00> : vector<2x32xf32>
    %191 = tpu.matmul %189, %190, %cst_249 {dimension_numbers = #tpu.dot_dimension_numbers<[1], [0], [0], [1], [0, 0, 1, 1], [], []>} : vector<2x96xf32>, vector<96x32xf32>, vector<2x32xf32> -> vector<2x32xf32>
    %c0_250 = arith.constant 0 : index
    %c0_251 = arith.constant 0 : index
    %192 = vector.load %arg15[%c0_250, %c0_251] : memref<2x32xf32, #tpu.memory_space<vmem>>, vector<2x32xf32>
    %193 = vector.extract_strided_slice %192 {offsets = [0, 0], sizes = [1, 32], strides = [1, 1]} : vector<2x32xf32> to vector<1x32xf32>
    %194 = vector.broadcast %193 : vector<1x32xf32> to vector<2x32xf32>
    %195 = arith.mulf %191, %194 : vector<2x32xf32>
    %196 = vector.extract_strided_slice %192 {offsets = [1, 0], sizes = [1, 32], strides = [1, 1]} : vector<2x32xf32> to vector<1x32xf32>
    %197 = vector.broadcast %196 : vector<1x32xf32> to vector<2x32xf32>
    %198 = arith.addf %195, %197 : vector<2x32xf32>
    %cst_252 = arith.constant 0.000000e+00 : f32
    %199 = vector.broadcast %cst_252 : f32 to vector<2x32xf32>
    %200 = arith.maximumf %198, %199 : vector<2x32xf32>
    %c1_253 = arith.constant 1 : index
    %c0_254 = arith.constant 0 : index
    %201 = vector.load %arg30[%c1_253, %c0_254] : memref<4x32xf32, #tpu.memory_space<vmem>>, vector<2x32xf32>
    tpu.vector_store %arg30[%c1_253, %c0_254], %200 {strides = array<i32>} : memref<4x32xf32, #tpu.memory_space<vmem>>, vector<2x32xf32>,
    %c1_255 = arith.constant 1 : index
    %c0_256 = arith.constant 0 : index
    %202 = vector.load %arg29[%c1_255, %c0_256] : memref<4x32xf32, #tpu.memory_space<vmem>>, vector<2x32xf32>
    %c0_257 = arith.constant 0 : index
    %c0_258 = arith.constant 0 : index
    %203 = vector.load %arg30[%c0_257, %c0_258] : memref<4x32xf32, #tpu.memory_space<vmem>>, vector<2x32xf32>
    %c0_259 = arith.constant 0 : index
    %c0_260 = arith.constant 0 : index
    %204 = vector.load %arg31[%c0_259, %c0_260] : memref<16x96xf32, #tpu.memory_space<vmem>>, vector<2x32xf32>
    tpu.vector_store %arg31[%c0_259, %c0_260], %203 {strides = array<i32>} : memref<16x96xf32, #tpu.memory_space<vmem>>, vector<2x32xf32>,
    %c1_261 = arith.constant 1 : index
    %c0_262 = arith.constant 0 : index
    %205 = vector.load %arg30[%c1_261, %c0_262] : memref<4x32xf32, #tpu.memory_space<vmem>>, vector<2x32xf32>
    %c0_263 = arith.constant 0 : index
    %c32_264 = arith.constant 32 : index
    %206 = vector.load %arg31[%c0_263, %c32_264] : memref<16x96xf32, #tpu.memory_space<vmem>>, vector<2x32xf32>
    tpu.vector_store %arg31[%c0_263, %c32_264], %205 {strides = array<i32>} : memref<16x96xf32, #tpu.memory_space<vmem>>, vector<2x32xf32>,
    %c2_265 = arith.constant 2 : index
    %c0_266 = arith.constant 0 : index
    %207 = vector.load %arg30[%c2_265, %c0_266] : memref<4x32xf32, #tpu.memory_space<vmem>>, vector<2x32xf32>
    %c0_267 = arith.constant 0 : index
    %c64_268 = arith.constant 64 : index
    %208 = vector.load %arg31[%c0_267, %c64_268] : memref<16x96xf32, #tpu.memory_space<vmem>>, vector<2x32xf32>
    tpu.vector_store %arg31[%c0_267, %c64_268], %207 {strides = array<i32>} : memref<16x96xf32, #tpu.memory_space<vmem>>, vector<2x32xf32>,
    %c0_269 = arith.constant 0 : index
    %c0_270 = arith.constant 0 : index
    %209 = vector.load %arg31[%c0_269, %c0_270] : memref<16x96xf32, #tpu.memory_space<vmem>>, vector<2x96xf32>
    %c0_271 = arith.constant 0 : index
    %c0_272 = arith.constant 0 : index
    %210 = vector.load %arg16[%c0_271, %c0_272] : memref<96x32xf32, #tpu.memory_space<vmem>>, vector<96x32xf32>
    %cst_273 = arith.constant dense<0.000000e+00> : vector<2x32xf32>
    %211 = tpu.matmul %209, %210, %cst_273 {dimension_numbers = #tpu.dot_dimension_numbers<[1], [0], [0], [1], [0, 0, 1, 1], [], []>} : vector<2x96xf32>, vector<96x32xf32>, vector<2x32xf32> -> vector<2x32xf32>
    %c0_274 = arith.constant 0 : index
    %c0_275 = arith.constant 0 : index
    %212 = vector.load %arg17[%c0_274, %c0_275] : memref<2x32xf32, #tpu.memory_space<vmem>>, vector<2x32xf32>
    %213 = vector.extract_strided_slice %212 {offsets = [0, 0], sizes = [1, 32], strides = [1, 1]} : vector<2x32xf32> to vector<1x32xf32>
    %214 = vector.broadcast %213 : vector<1x32xf32> to vector<2x32xf32>
    %215 = arith.mulf %211, %214 : vector<2x32xf32>
    %216 = vector.extract_strided_slice %212 {offsets = [1, 0], sizes = [1, 32], strides = [1, 1]} : vector<2x32xf32> to vector<1x32xf32>
    %217 = vector.broadcast %216 : vector<1x32xf32> to vector<2x32xf32>
    %218 = arith.addf %215, %217 : vector<2x32xf32>
    %219 = arith.addf %218, %202 : vector<2x32xf32>
    %cst_276 = arith.constant 0.000000e+00 : f32
    %220 = vector.broadcast %cst_276 : f32 to vector<2x32xf32>
    %221 = arith.maximumf %219, %220 : vector<2x32xf32>
    %cst_277 = arith.constant dense<0.000000e+00> : vector<32xf32>
    %222 = vector.multi_reduction <add>, %221, %cst_277 [0] : vector<2x32xf32> to vector<32xf32>
    %223 = vector.shape_cast %222 : vector<32xf32> to vector<1x32xf32>
    %cst_278 = arith.constant 2.000000e+00 : f32
    %224 = vector.broadcast %cst_278 : f32 to vector<1x32xf32>
    %225 = arith.divf %223, %224 : vector<1x32xf32>
    %c0_279 = arith.constant 0 : index
    %c0_280 = arith.constant 0 : index
    %226 = vector.load %arg18[%c0_279, %c0_280] : memref<32x32xf32, #tpu.memory_space<vmem>>, vector<32x32xf32>
    %cst_281 = arith.constant dense<0.000000e+00> : vector<1x32xf32>
    %227 = tpu.matmul %225, %226, %cst_281 {dimension_numbers = #tpu.dot_dimension_numbers<[1], [0], [0], [1], [0, 0, 1, 1], [], []>} : vector<1x32xf32>, vector<32x32xf32>, vector<1x32xf32> -> vector<1x32xf32>
    %c0_282 = arith.constant 0 : index
    %c0_283 = arith.constant 0 : index
    %228 = vector.load %arg19[%c0_282, %c0_283] : memref<1x32xf32, #tpu.memory_space<vmem>>, vector<1x32xf32>
    %229 = arith.addf %227, %228 : vector<1x32xf32>
    %cst_284 = arith.constant 5.000000e-01 : f32
    %230 = vector.broadcast %cst_284 : f32 to vector<1x32xf32>
    %231 = arith.mulf %230, %229 : vector<1x32xf32>
    %cst_285 = arith.constant 0.707106769 : f32
    %232 = vector.broadcast %cst_285 : f32 to vector<1x32xf32>
    %233 = arith.mulf %229, %232 : vector<1x32xf32>
    %234 = math.absf %233 : vector<1x32xf32>
    %cst_286 = arith.constant 0.327591091 : f32
    %235 = vector.broadcast %cst_286 : f32 to vector<1x32xf32>
    %236 = arith.mulf %235, %234 : vector<1x32xf32>
    %cst_287 = arith.constant 1.000000e+00 : f32
    %237 = vector.broadcast %cst_287 : f32 to vector<1x32xf32>
    %238 = arith.addf %237, %236 : vector<1x32xf32>
    %cst_288 = arith.constant 1.000000e+00 : f32
    %239 = vector.broadcast %cst_288 : f32 to vector<1x32xf32>
    %240 = arith.divf %239, %238 : vector<1x32xf32>
    %cst_289 = arith.constant 1.06140542 : f32
    %241 = vector.broadcast %cst_289 : f32 to vector<1x32xf32>
    %242 = arith.mulf %241, %240 : vector<1x32xf32>
    %cst_290 = arith.constant -1.45315206 : f32
    %243 = vector.broadcast %cst_290 : f32 to vector<1x32xf32>
    %244 = arith.addf %242, %243 : vector<1x32xf32>
    %245 = arith.mulf %244, %240 : vector<1x32xf32>
    %cst_291 = arith.constant 1.42141378 : f32
    %246 = vector.broadcast %cst_291 : f32 to vector<1x32xf32>
    %247 = arith.addf %245, %246 : vector<1x32xf32>
    %248 = arith.mulf %247, %240 : vector<1x32xf32>
    %cst_292 = arith.constant -0.284496725 : f32
    %249 = vector.broadcast %cst_292 : f32 to vector<1x32xf32>
    %250 = arith.addf %248, %249 : vector<1x32xf32>
    %251 = arith.mulf %250, %240 : vector<1x32xf32>
    %cst_293 = arith.constant 0.254829586 : f32
    %252 = vector.broadcast %cst_293 : f32 to vector<1x32xf32>
    %253 = arith.addf %251, %252 : vector<1x32xf32>
    %254 = arith.mulf %253, %240 : vector<1x32xf32>
    %cst_294 = arith.constant 0.000000e+00 : f32
    %255 = vector.broadcast %cst_294 : f32 to vector<1x32xf32>
    %256 = arith.subf %255, %234 : vector<1x32xf32>
    %257 = arith.mulf %256, %234 : vector<1x32xf32>
    %258 = math.exp %257 : vector<1x32xf32>
    %259 = arith.mulf %254, %258 : vector<1x32xf32>
    %cst_295 = arith.constant 1.000000e+00 : f32
    %260 = vector.broadcast %cst_295 : f32 to vector<1x32xf32>
    %261 = arith.subf %260, %259 : vector<1x32xf32>
    %cst_296 = arith.constant 0.000000e+00 : f32
    %262 = vector.broadcast %cst_296 : f32 to vector<1x32xf32>
    %263 = arith.cmpf oge, %233, %262 : vector<1x32xf32>
    %cst_297 = arith.constant 0.000000e+00 : f32
    %264 = vector.broadcast %cst_297 : f32 to vector<1x32xf32>
    %265 = arith.subf %264, %261 : vector<1x32xf32>
    %266 = arith.select %263, %261, %265 : vector<1x32xi1>, vector<1x32xf32>
    %cst_298 = arith.constant 1.000000e+00 : f32
    %267 = vector.broadcast %cst_298 : f32 to vector<1x32xf32>
    %268 = arith.addf %267, %266 : vector<1x32xf32>
    %269 = arith.mulf %231, %268 : vector<1x32xf32>
    %c0_299 = arith.constant 0 : index
    %c0_300 = arith.constant 0 : index
    %270 = vector.load %arg20[%c0_299, %c0_300] : memref<32x16xf32, #tpu.memory_space<vmem>>, vector<32x16xf32>
    %cst_301 = arith.constant dense<0.000000e+00> : vector<1x16xf32>
    %271 = tpu.matmul %269, %270, %cst_301 {dimension_numbers = #tpu.dot_dimension_numbers<[1], [0], [0], [1], [0, 0, 1, 1], [], []>} : vector<1x32xf32>, vector<32x16xf32>, vector<1x16xf32> -> vector<1x16xf32>
    %c0_302 = arith.constant 0 : index
    %c0_303 = arith.constant 0 : index
    %272 = vector.load %arg21[%c0_302, %c0_303] : memref<1x16xf32, #tpu.memory_space<vmem>>, vector<1x16xf32>
    %273 = arith.addf %271, %272 : vector<1x16xf32>
    %cst_304 = arith.constant 0.000000e+00 : f32
    %274 = vector.broadcast %cst_304 : f32 to vector<1x16xf32>
    %275 = arith.maximumf %273, %274 : vector<1x16xf32>
    %c0_305 = arith.constant 0 : index
    %c0_306 = arith.constant 0 : index
    %276 = vector.load %arg22[%c0_305, %c0_306] : memref<16x8xf32, #tpu.memory_space<vmem>>, vector<16x8xf32>
    %cst_307 = arith.constant dense<0.000000e+00> : vector<1x8xf32>
    %277 = tpu.matmul %275, %276, %cst_307 {dimension_numbers = #tpu.dot_dimension_numbers<[1], [0], [0], [1], [0, 0, 1, 1], [], []>} : vector<1x16xf32>, vector<16x8xf32>, vector<1x8xf32> -> vector<1x8xf32>
    %c0_308 = arith.constant 0 : index
    %c0_309 = arith.constant 0 : index
    %278 = vector.load %arg23[%c0_308, %c0_309] : memref<1x8xf32, #tpu.memory_space<vmem>>, vector<1x8xf32>
    %279 = arith.addf %277, %278 : vector<1x8xf32>
    %c0_310 = arith.constant 0 : index
    %c0_311 = arith.constant 0 : index
    %c0_312 = arith.constant 0 : index
    %280 = vector.load %arg24[%c0_310, %c0_311, %c0_312] : memref<1x1x8xf32, #tpu.memory_space<vmem>>, vector<1x1x8xf32>
    %281 = vector.shape_cast %280 : vector<1x1x8xf32> to vector<1x8xf32>
    %282 = vector.shape_cast %279 : vector<1x8xf32> to vector<1x1x8xf32>
    tpu.vector_store %arg24[%c0_310, %c0_311, %c0_312], %282 {strides = array<i32>} : memref<1x1x8xf32, #tpu.memory_space<vmem>>, vector<1x1x8xf32>,
    return
  }
  func.func @transform_0(%arg0: i32) -> (i32, i32, i32) {
    %c0_i32 = arith.constant 0 : i32
    %c0_i32_0 = arith.constant 0 : i32
    %c0_i32_1 = arith.constant 0 : i32
    return %arg0, %c0_i32, %c0_i32_0 : i32, i32, i32
  }
  func.func @transform_1(%arg0: i32) -> (i32, i32) {
    %c0_i32 = arith.constant 0 : i32
    %c0_i32_0 = arith.constant 0 : i32
    %c0_i32_1 = arith.constant 0 : i32
    return %c0_i32, %c0_i32_0 : i32, i32
  }
  func.func @transform_2(%arg0: i32) -> (i32, i32) {
    %c0_i32 = arith.constant 0 : i32
    %c0_i32_0 = arith.constant 0 : i32
    %c0_i32_1 = arith.constant 0 : i32
    return %c0_i32, %c0_i32_0 : i32, i32
  }
  func.func @transform_3(%arg0: i32) -> (i32, i32) {
    %c0_i32 = arith.constant 0 : i32
    %c0_i32_0 = arith.constant 0 : i32
    %c0_i32_1 = arith.constant 0 : i32
    return %c0_i32, %c0_i32_0 : i32, i32
  }
  func.func @transform_4(%arg0: i32) -> (i32, i32) {
    %c0_i32 = arith.constant 0 : i32
    %c0_i32_0 = arith.constant 0 : i32
    %c0_i32_1 = arith.constant 0 : i32
    return %c0_i32, %c0_i32_0 : i32, i32
  }
  func.func @transform_5(%arg0: i32) -> (i32, i32) {
    %c0_i32 = arith.constant 0 : i32
    %c0_i32_0 = arith.constant 0 : i32
    %c0_i32_1 = arith.constant 0 : i32
    return %c0_i32, %c0_i32_0 : i32, i32
  }
  func.func @transform_6(%arg0: i32) -> (i32, i32) {
    %c0_i32 = arith.constant 0 : i32
    %c0_i32_0 = arith.constant 0 : i32
    %c0_i32_1 = arith.constant 0 : i32
    return %c0_i32, %c0_i32_0 : i32, i32
  }
  func.func @transform_7(%arg0: i32) -> (i32, i32) {
    %c0_i32 = arith.constant 0 : i32
    %c0_i32_0 = arith.constant 0 : i32
    %c0_i32_1 = arith.constant 0 : i32
    return %c0_i32, %c0_i32_0 : i32, i32
  }
  func.func @transform_8(%arg0: i32) -> (i32, i32) {
    %c0_i32 = arith.constant 0 : i32
    %c0_i32_0 = arith.constant 0 : i32
    %c0_i32_1 = arith.constant 0 : i32
    return %c0_i32, %c0_i32_0 : i32, i32
  }
  func.func @transform_9(%arg0: i32) -> (i32, i32) {
    %c0_i32 = arith.constant 0 : i32
    %c0_i32_0 = arith.constant 0 : i32
    %c0_i32_1 = arith.constant 0 : i32
    return %c0_i32, %c0_i32_0 : i32, i32
  }
  func.func @transform_10(%arg0: i32) -> (i32, i32) {
    %c0_i32 = arith.constant 0 : i32
    %c0_i32_0 = arith.constant 0 : i32
    %c0_i32_1 = arith.constant 0 : i32
    return %c0_i32, %c0_i32_0 : i32, i32
  }
  func.func @transform_11(%arg0: i32) -> (i32, i32) {
    %c0_i32 = arith.constant 0 : i32
    %c0_i32_0 = arith.constant 0 : i32
    %c0_i32_1 = arith.constant 0 : i32
    return %c0_i32, %c0_i32_0 : i32, i32
  }
  func.func @transform_12(%arg0: i32) -> (i32, i32) {
    %c0_i32 = arith.constant 0 : i32
    %c0_i32_0 = arith.constant 0 : i32
    %c0_i32_1 = arith.constant 0 : i32
    return %c0_i32, %c0_i32_0 : i32, i32
  }
  func.func @transform_13(%arg0: i32) -> (i32, i32) {
    %c0_i32 = arith.constant 0 : i32
    %c0_i32_0 = arith.constant 0 : i32
    %c0_i32_1 = arith.constant 0 : i32
    return %c0_i32, %c0_i32_0 : i32, i32
  }
  func.func @transform_14(%arg0: i32) -> (i32, i32) {
    %c0_i32 = arith.constant 0 : i32
    %c0_i32_0 = arith.constant 0 : i32
    %c0_i32_1 = arith.constant 0 : i32
    return %c0_i32, %c0_i32_0 : i32, i32
  }
  func.func @transform_15(%arg0: i32) -> (i32, i32) {
    %c0_i32 = arith.constant 0 : i32
    %c0_i32_0 = arith.constant 0 : i32
    %c0_i32_1 = arith.constant 0 : i32
    return %c0_i32, %c0_i32_0 : i32, i32
  }
  func.func @transform_16(%arg0: i32) -> (i32, i32) {
    %c0_i32 = arith.constant 0 : i32
    %c0_i32_0 = arith.constant 0 : i32
    %c0_i32_1 = arith.constant 0 : i32
    return %c0_i32, %c0_i32_0 : i32, i32
  }
  func.func @transform_17(%arg0: i32) -> (i32, i32) {
    %c0_i32 = arith.constant 0 : i32
    %c0_i32_0 = arith.constant 0 : i32
    %c0_i32_1 = arith.constant 0 : i32
    return %c0_i32, %c0_i32_0 : i32, i32
  }
  func.func @transform_18(%arg0: i32) -> (i32, i32) {
    %c0_i32 = arith.constant 0 : i32
    %c0_i32_0 = arith.constant 0 : i32
    %c0_i32_1 = arith.constant 0 : i32
    return %c0_i32, %c0_i32_0 : i32, i32
  }
  func.func @transform_19(%arg0: i32) -> (i32, i32) {
    %c0_i32 = arith.constant 0 : i32
    %c0_i32_0 = arith.constant 0 : i32
    %c0_i32_1 = arith.constant 0 : i32
    return %c0_i32, %c0_i32_0 : i32, i32
  }
  func.func @transform_20(%arg0: i32) -> (i32, i32) {
    %c0_i32 = arith.constant 0 : i32
    %c0_i32_0 = arith.constant 0 : i32
    %c0_i32_1 = arith.constant 0 : i32
    return %c0_i32, %c0_i32_0 : i32, i32
  }
  func.func @transform_21(%arg0: i32) -> (i32, i32) {
    %c0_i32 = arith.constant 0 : i32
    %c0_i32_0 = arith.constant 0 : i32
    %c0_i32_1 = arith.constant 0 : i32
    return %c0_i32, %c0_i32_0 : i32, i32
  }
  func.func @transform_22(%arg0: i32) -> (i32, i32) {
    %c0_i32 = arith.constant 0 : i32
    %c0_i32_0 = arith.constant 0 : i32
    %c0_i32_1 = arith.constant 0 : i32
    return %c0_i32, %c0_i32_0 : i32, i32
  }
  func.func @transform_23(%arg0: i32) -> (i32, i32, i32) {
    %c0_i32 = arith.constant 0 : i32
    %c0_i32_0 = arith.constant 0 : i32
    %c0_i32_1 = arith.constant 0 : i32
    return %arg0, %c0_i32, %c0_i32_0 : i32, i32, i32
  }
}

</mosaic_0001>

<bundles_post_ra>
// kernel: cnn1d_large_forward.1
= control target key start
LH: loop header
LB: loop body
LE: loop exit
PB: predicated region body
PF: predicated region fallthrough
CT: control target
= control target key end

     0   :  { %s2514_s0 = inlined_call_operand.vmem [shape: f32[2,16,4], index: 0, kind: input, shape index: {}]   ;;  %s2515_s1 = inlined_call_operand.vmem [shape: f32[60,4], index: 1, kind: input, shape index: {}]   ;;  %s2516_s2 = inlined_call_operand.vmem [shape: f32[2,4], index: 2, kind: input, shape index: {}]   ;;  %s2517_s3 = inlined_call_operand.vmem [shape: f32[44,8], index: 3, kind: input, shape index: {}]   ;;  %s2518_s4 = inlined_call_operand.vmem [shape: f32[2,8], index: 4, kind: input, shape index: {}]   ;;  %s2519_s5 = inlined_call_operand.vmem [shape: f32[56,16], index: 5, kind: input, shape index: {}]   ;;  %s2520_s6 = inlined_call_operand.vmem [shape: f32[2,16], index: 6, kind: input, shape index: {}]   ;;  %s2521_s7 = inlined_call_operand.vmem [shape: f32[80,32], index: 7, kind: input, shape index: {}]   ;;  %s2522_s8 = inlined_call_operand.vmem [shape: f32[2,32], index: 8, kind: input, shape index: {}]   ;;  %s2523_s9 = inlined_call_operand.vmem [shape: f32[96,32], index: 9, kind: input, shape index: {}]   ;;  %s2524_s10 = inlined_call_operand.vmem [shape: f32[2,32], index: 10, kind: input, shape index: {}]   ;;  %s2525_s11 = inlined_call_operand.vmem [shape: f32[96,32], index: 11, kind: input, shape index: {}]   ;;  %s2526_s12 = inlined_call_operand.vmem [shape: f32[2,32], index: 12, kind: input, shape index: {}]   ;;  %s2527_s13 = inlined_call_operand.vmem [shape: f32[96,32], index: 13, kind: input, shape index: {}]   ;;  %s2528_s14 = inlined_call_operand.vmem [shape: f32[2,32], index: 14, kind: input, shape index: {}]   ;;  %s2529_s15 = inlined_call_operand.vmem [shape: f32[96,32], index: 15, kind: input, shape index: {}]   ;;  %s2530_s16 = inlined_call_operand.vmem [shape: f32[2,32], index: 16, kind: input, shape index: {}]   ;;  %s2531_s17 = inlined_call_operand.vmem [shape: f32[32,32], index: 17, kind: input, shape index: {}]   ;;  %s2532_s18 = inlined_call_operand.vmem [shape: f32[1,32], index: 18, kind: input, shape index: {}]   ;;  %s2533_s19 = inlined_call_operand.vmem [shape: f32[32,16], index: 19, kind: input, shape index: {}]   ;;  %s2534_s20 = inlined_call_operand.vmem [shape: f32[1,16], index: 20, kind: input, shape index: {}]   ;;  %s2535_s21 = inlined_call_operand.vmem [shape: f32[16,8], index: 21, kind: input, shape index: {}]   ;;  %s2536_s22 = inlined_call_operand.vmem [shape: f32[1,8], index: 22, kind: input, shape index: {}]   ;;  %s2537_s23 = inlined_call_operand.hbm [shape: f32[2,1,8], index: 23, kind: output, shape index: {}]  }
   0x1   :  { %2579 = sst [smem:[#allocation21_spill]] %s2514_s0 }
   0x2   :  { %2580 = sst [smem:[#allocation22_spill]] %s2515_s1 }
   0x3   :  { %2581 = sst [smem:[#allocation23_spill]] %s2516_s2 }
   0x4   :  { %2582 = sst [smem:[#allocation24_spill]] %s2517_s3 }
   0x5   :  { %2583 = sst [smem:[#allocation25_spill]] %s2518_s4 }
   0x6   :  { %2584 = sst [smem:[#allocation26_spill]] %s2519_s5 }
   0x7   :  { %2585 = sst [smem:[#allocation27_spill]] %s2520_s6 }
   0x8   :  { %2586 = sst [smem:[#allocation28_spill]] %s2521_s7 }
   0x9   :  { %2587 = sst [smem:[#allocation29_spill]] %s2534_s20 }
   0xa   :  { %2588 = sst [smem:[#allocation30_spill]] %s2536_s22 }
   0xb   :  { %2589 = sst [smem:[#allocation31_spill]] %s2537_s23 }
   0xc   :  { %28 = vsyncpa [#allocation10], 0 }
   0xd   :  { %30 = vsyncpa [#allocation10 + $0x1], 0  ;;  %s1984_s4 = smov 0   ;;  %s1986_s30 = smov 0  }
   0xe   :  { %s1988_s24 = smov 0   ;;  %s1990_s25 = smov 0  }
   0xf LB: > { %2590 = sst [smem:[#allocation12_spill]] %s1833_s4  ;;  %s2005_s5 = sadd.s32 4294967295, %s1845_s25   ;;  %s1845_s25 = sphi %s1990_s25, %s2633_s25   ;;  %s1841_s24 = sphi %s1988_s24, %s2636_s24   ;;  %s1837_s30 = sphi %s1986_s30, %s2635_s30   ;;  %s1833_s4 = sphi %s1984_s4, %s2634_s4  }
  0x10   : > { %2591 = sst [smem:[#allocation13_spill]] %s1837_s30  ;;  %s1698_s1 = sadd.s32 4294967294, %s1845_s25  }
  0x11   : > { %2592 = sst [smem:[#allocation14_spill]] %s1841_s24  ;;  %s2009_s26 = sadd.s32 1, %s1845_s25  }
  0x12   : > { %2593 = sst [smem:[#allocation15_spill]] %s1845_s25  ;;  %s531_s2 = sadd.s32 1, %s1841_s24 }
  0x13   : > { %2594 = sst [smem:[#allocation16_spill]] %s2005_s5  ;;  %s528_s6 = ssub.s32 %s1845_s25, %s2009_s26 }
  0x14   : > { %2595 = sst [smem:[#allocation17_spill]] %s2009_s26  ;;  %p541_p0 = scmp.ne.s32.totalorder %s1841_s24, %s1837_s30 }
  0x15   : > { %p529_p1 = scmp.eq.s32.totalorder %s528_s6, 0  ;;  %p542_p2 = scmp.eq.s32.totalorder %s2005_s5, 1 }
  0x16   : > { %p547_p3 = scmp.ne.s32.totalorder %s1837_s30, %s1833_s4  ;;  %p548_p4 = scmp.eq.s32.totalorder %s1698_s1, 1 }
  0x17   : > { %s2020_s27 = scalar_select %p529_p1, %s1841_s24, %s531_s2  }
  0x18   : > { %p2022_p5 = por %p542_p2, %p541_p0  ;;  %p2026_p6 = por %p548_p4, %p547_p3 }
  0x19   : > { %2596 = sst [smem:[#allocation18_spill]] %s2020_s27  ;;  %p1701_p7 = scmp.ge.s32.totalorder %s1845_s25, 1 }
  0x1a   : > { %s2597_s7 = scalar_select %p2022_p5, 1, 0 }
  0x1b   : > { %s2599_s28 = scalar_select %p2026_p6, 1, 0 }
  0x1c   : > { %2598 = sst [smem:[#allocation19_spill]] %s2597_s7  ;;  %p640_p8 = scmp.lt.s32.totalorder %s1845_s25, 3 }
  0x1d   : > { %2600 = sst [smem:[#allocation20_spill]] %s2599_s28 }
  0x1e   : > { %p641_p9 = pnand %p1701_p7, %p640_p8 }
  0x1f   : > { %p703_p10 = scmp.lt.s32.totalorder (!%p641_p9), %s2005_s5, 1  ;;  %s2601_s2 = sld [smem:[#allocation21_spill]] (!%p641_p9) }
  0x20   : > { %644 = sbr.rel (%p641_p9) target bundleno = 2754 (0xac2), region = 112  ;;  %s2542_s27 = smov (!%p641_p9), 12  }
  0x21   : > { %s2558_s0 = smov (!%p641_p9), 8   ;;  %s2550_s1 = smov (!%p641_p9), 16  }
  0x22   : > { %s2604_s24 = smov (!%p641_p9), 20   ;;  %s2606_s26 = smov (!%p641_p9), 28  }
  0x23   : > { %s2607_s28 = smov (!%p641_p9), 32   ;;  %s2608_s4 = smov (!%p641_p9), 36  }
  0x24   : > { %s2610_s25 = smov (!%p641_p9), 48   ;;  %s2612_s22 = sld [smem:[#allocation23_spill]] (!%p641_p9) }
  0x25   : > { %vm708_vm0 = vcmask 31744   ;;  %v1847_v0 = vmov 0.0   ;;  %s704_s29 = scalar_select %p703_p10, %s2005_s5, 1  ;;  %vm712_vm1 = vcmask 29696   ;;  %vm746_vm2 = vcmask 64544  }
  0x26   : > { %709 = vst.msk [vmem:[#allocation2] sm:$0xff] %vm708_vm0, %v1847_v0  ;;  %vm759_vm3 = vcmask 97344   ;;  %vm772_vm4 = vcmask 130144   ;;  %vm2574_vm5 = vcmask 162944   ;;  %vm798_vm6 = vcmask 195744   ;;  %s2613_s7 = smov 8  }
  0x27   : > { %710 = vst.msk [vmem:[#allocation2 + $0x8] sm:$0xff] %vm708_vm0, %v1847_v0  ;;  %s1720_s3 = sshll.u32 %s704_s29, 4  ;;  %s2554_s29 = smov 4   ;;  %vm811_vm7 = vcmask 228544   ;;  %vm935_vm8 = vcmask 1043456   ;;  %vm824_vm9 = vcmask 261344  }
  0x28   : > { %711 = vst.msk [vmem:[#allocation2 + $0x10] sm:$0xff] %vm708_vm0, %v1847_v0  ;;  %s707_s6 = scalar_lea.vmem %s2601_s2, %s1720_s3  ;;  %s2544_s3 = smov 20   ;;  %vm837_vm10 = vcmask 294144   ;;  %vm850_vm11 = vcmask 326944   ;;  %vm2575_vm12 = vcmask 359744   ;;  %vm876_vm13 = vcmask 392544  }
  0x29   : > { %714 = vst.msk [vmem:[#allocation3] sm:$0xff] %vm708_vm0, %v1847_v0  ;;  %v728_v1 = vld [vmem:[%s707_s6] sm:$0xff]  ;;  %v729_v2 = vld [vmem:[%s707_s6 + $0x8] sm:$0xff]  ;;  %s2546_s2 = smov 24   ;;  %s2548_s6 = smov 28   ;;  %vm889_vm14 = vcmask 425344  }
  0x2a   : > { %715 = vst.msk [vmem:[#allocation3 + $0x8] sm:$0xff] %vm708_vm0, %v1847_v0  ;;  %vm902_vm15 = vcmask 458144   ;;  %s2614_s20 = smov 4   ;;  %s2615_s30 = sld [smem:[#allocation24_spill]] }
  0x2b   : > { %716 = vst.msk [vmem:[#allocation3 + $0x10] sm:$0xff] %vm708_vm0, %v1847_v0 }
  0x2c   : > { %730 = vst.msk [vmem:[#allocation2 + $0x7] sm:$0xff] %vm708_vm0, %v728_v1  ;;  %v962_v1 = vld [vmem:[%s2612_s22] sm:$0x3] }
  0x2d   : > { %731 = vst.msk [vmem:[#allocation2 + $0xf] sm:$0xff] %vm708_vm0, %v729_v2  ;;  %v963_v2 = vperm.slane %v962_v1, 0 }
  0x2e   : > { %713 = vst.msk [vmem:[#allocation2 + $0x18] sm:$0x3f] %vm712_vm1, %v1847_v0  ;;  %vm915_vm1 = vcmask 490944  }
  0x30   : > { %s2616_s5 = smov %s2615_s30 }
  0x33   : > { %v736_v3 = vld [vmem:[#allocation2 + $0x1] sm:$0xff] }
  0x34   : > { %v762_v4 = vld [vmem:[#allocation2 + $0x3] sm:$0xff]  ;;  %740 = vrot.lane.b32.xlu0 %v736_v3, %s2554_s29  ;;  %v763_v13 = vld [vmem:[#allocation2 + $0xb] sm:$0xff]  ;;  %v966_v3 = vperm.slane %v962_v1, 1 }
  0x35   : > { %766 = vrot.lane.b32.xlu1 %v762_v4, %s2542_s27  ;;  %v827_v5 = vld [vmem:[#allocation2 + $0x8] sm:$0xff]  ;;  %s2552_s27 = smov 32   ;;  %v828_v18 = vld [vmem:[#allocation2 + $0x10] sm:$0xff]  ;;  %v732_v25 = vld [vmem:[#allocation2] sm:$0xff] }
  0x36   : > { %v788_v6 = vld [vmem:[#allocation2 + $0x5] sm:$0xff]  ;;  %735 = vst.msk [vmem:[#allocation8 + $0x8] sm:$0xff] %vm708_vm0, %v827_v5  ;;  %v789_v15 = vld [vmem:[#allocation2 + $0xd] sm:$0xff]  ;;  %v893_v23 = vld [vmem:[#allocation2 + $0x15] sm:$0xff] }
  0x37   : > { %792 = vrot.lane.b32.xlu2 %v788_v6, %s2544_s3  ;;  %v749_v7 = vld [vmem:[#allocation2 + $0x2] sm:$0xff]  ;;  %v750_v12 = vld [vmem:[#allocation2 + $0xa] sm:$0xff]  ;;  %s2556_s3 = smov 36   ;;  %v854_v20 = vld [vmem:[#allocation2 + $0x12] sm:$0xff]  ;;  %734 = vst.msk [vmem:[#allocation8] sm:$0xff] %vm708_vm0, %v732_v25 }
  0x38   : > { %v775_v8 = vld [vmem:[#allocation2 + $0x4] sm:$0xff]  ;;  %v879_v14 = vld [vmem:[#allocation2 + $0xc] sm:$0xff]  ;;  %v880_v22 = vld [vmem:[#allocation2 + $0x14] sm:$0xff] }
  0x39   : > { %v801_v9 = vld [vmem:[#allocation2 + $0x6] sm:$0xff]  ;;  %v802_v16 = vld [vmem:[#allocation2 + $0xe] sm:$0xff]  ;;  %v906_v24 = vld [vmem:[#allocation2 + $0x16] sm:$0xff] }
  0x3a   : > { %v814_v10 = vld [vmem:[#allocation2 + $0x7] sm:$0xff]  ;;  %v815_v17 = vld [vmem:[#allocation2 + $0xf] sm:$0xff]  ;;  %v1049_v25 = vld [vmem:[%s2616_s5 + $0x18] sm:$0xff] }
  0x3b   : > { %v840_v11 = vld [vmem:[#allocation2 + $0x9] sm:$0xff]  ;;  %v841_v19 = vld [vmem:[#allocation2 + $0x11] sm:$0xff] }
  0x3c   : > { %753 = vrot.lane.b32.xlu0 %v749_v7, %s2558_s0  ;;  %v867_v21 = vld [vmem:[#allocation2 + $0x13] sm:$0xff] }
  0x3d   : > { %779 = vrot.lane.b32.xlu1 %v775_v8, %s2550_s1  ;;  %s1858_s1 = smov 44  }
  0x3f   : > { %805 = vrot.lane.b32.xlu2 %v801_v9, %s2546_s2  ;;  %s2560_s2 = smov 40  }
  0x44   : > { %818 = vrot.lane.b32.xlu0 %v814_v10, %s2548_s6  ;;  %s2602_s6 = smov 12  }
  0x45   : > { %831 = vrot.lane.b32.xlu1 %v827_v5, %s2552_s27  ;;  %s2603_s27 = smov 16  }
  0x47   : > { %742 = vrot.lane.b32.xlu2 %v840_v11, %s2554_s29  ;;  %s2566_s29 = smov 48  }
  0x4c   : > { %844 = vrot.lane.b32.xlu0 %v840_v11, %s2556_s3  ;;  %s1860_s3 = smov 52  }
  0x4d   : > { %755 = vrot.lane.b32.xlu1 %v750_v12, %s2558_s0  ;;  %s2605_s0 = smov 24  }
  0x4f   : > { %857 = vrot.lane.b32.xlu2 %v750_v12, %s2560_s2  ;;  %s1861_s2 = smov 56  }
  0x54   : > { %768 = vrot.lane.b32.xlu0 %v763_v13, %s2602_s6 }
  0x55   : > { %870 = vrot.lane.b32.xlu1 %v763_v13, %s1858_s1 }
  0x57   : > { %781 = vrot.lane.b32.xlu2 %v879_v14, %s2603_s27 }
  0x5c   : > { %883 = vrot.lane.b32.xlu0 %v879_v14, %s2566_s29  ;;  %s2609_s29 = smov 40  }
  0x5d   : > { %794 = vrot.lane.b32.xlu1 %v789_v15, %s2604_s24 }
  0x5f   : > { %896 = vrot.lane.b32.xlu2 %v789_v15, %s1860_s3 }
  0x64   : > { %807 = vrot.lane.b32.xlu0 %v802_v16, %s2605_s0 }
  0x65   : > { %909 = vrot.lane.b32.xlu1 %v802_v16, %s1861_s2 }
  0x67   : > { %820 = vrot.lane.b32.xlu2 %v815_v17, %s2606_s26 }
  0x6c   : > { %833 = vrot.lane.b32.xlu0 %v828_v18, %s2607_s28 }
  0x6d   : > { %846 = vrot.lane.b32.xlu1 %v841_v19, %s2608_s4 }
  0x6f   : > { %859 = vrot.lane.b32.xlu2 %v854_v20, %s2609_s29 }
  0x74   : > { %872 = vrot.lane.b32.xlu0 %v867_v21, %s1858_s1 }
  0x75   : > { %885 = vrot.lane.b32.xlu1 %v880_v22, %s2610_s25 }
  0x77   : > { %898 = vrot.lane.b32.xlu2 %v893_v23, %s1860_s3  ;;  %v1051_v23 = vld [vmem:[%s2615_s30 + $0x28] sm:$0xf]  ;;  %s2622_s30 = sld [smem:[#allocation28_spill]] }
  0x78   : > { %1707 = vmatpush.msk.msra.mxu1 %vm935_vm8, %v1051_v23 }
  0x7c   : > { %911 = vrot.lane.b32.xlu0 %v906_v24, %s1861_s2  ;;  %s2611_s2 = sld [smem:[#allocation22_spill]]  ;;  %v1050_v24 = vld [vmem:[%s2616_s5 + $0x20] sm:$0xff] }
  0x7d   : > { %1070 = vmatpush.msra.mxu1 %v1050_v24  ;;  %s2623_s3 = smov %s2622_s30 }
  0x7e   : > { %v1216_v23 = vld [vmem:[%s2623_s3 + $0x18] sm:$0xff]  ;;  %v1215_v24 = vld [vmem:[%s2623_s3 + $0x10] sm:$0xff] }
  0x7f   : > { %1071 = vmatpush.msra.mxu1 %v1049_v25  ;;  %v1214_v25 = vld [vmem:[%s2623_s3 + $0x8] sm:$0xff] }
  0x82   : > { %v927_v33 = vld [vmem:[%s2611_s2 + $0x38] sm:$0xf]  ;;  %v926_v37 = vld [vmem:[%s2611_s2 + $0x30] sm:$0xff]  ;;  %v925_v38 = vld [vmem:[%s2611_s2 + $0x28] sm:$0xff] }
  0x83   : > { %1704 = vmatpush.msk.msra.mxu0 %vm935_vm8, %v927_v33  ;;  %v924_v39 = vld [vmem:[%s2611_s2 + $0x20] sm:$0xff]  ;;  %v923_v40 = vld [vmem:[%s2611_s2 + $0x18] sm:$0xff]  ;;  %v922_v44 = vld [vmem:[%s2611_s2 + $0x10] sm:$0xff]  ;;  %vm2617_vm8 = vcmask 162944  }
  0x84   : > { %v921_v45 = vld [vmem:[%s2611_s2 + $0x8] sm:$0xff]  ;;  %v920_v46 = vld [vmem:[%s2611_s2] sm:$0xff] }
  0x85   : > { %948 = vmatpush.msra.mxu0 %v926_v37 }
  0x87   : > { %949 = vmatpush.msra.mxu0 %v925_v38 }
  0x89   : > { %950 = vmatpush.msra.mxu0 %v924_v39 }
  0x8b   : > { %951 = vmatpush.msra.mxu0 %v923_v40 }
  0x8d   : > { %952 = vmatpush.msra.mxu0 %v922_v44 }
  0x8f   : > { %953 = vmatpush.msra.mxu0 %v921_v45 }
  0x91   : > { %v793_v26 = vpop.permute.xlu2 %792  ;;  %954 = vmatpush.msra.mxu0 %v920_v46 }
  0x99   : > { %v806_v27 = vpop.permute.xlu2 %805 }
  0xa1   : > { %v743_v28 = vpop.permute.xlu2 %742 }
  0xa2   : > { %748 = vst.msk [vmem:[#allocation8 + $0x8] sm:$0xff] %vm746_vm2, %v743_v28 }
  0xa6   : > { %v741_v29 = vpop.permute.xlu0 %740 }
  0xa7   : > { %v767_v30 = vpop.permute.xlu1 %766  ;;  %747 = vst.msk [vmem:[#allocation8] sm:$0xff] %vm746_vm2, %v741_v29  ;;  %v1047_v29 = vld [vmem:[%s2616_s5 + $0x8] sm:$0xff] }
  0xa9   : > { %v858_v34 = vpop.permute.xlu2 %857 }
  0xae   : > { %v754_v31 = vpop.permute.xlu0 %753 }
  0xaf   : > { %v780_v32 = vpop.permute.xlu1 %779  ;;  %760 = vst.msk [vmem:[#allocation8] sm:$0xff] %vm759_vm3, %v754_v31  ;;  %v1046_v31 = vld [vmem:[%s2616_s5] sm:$0xff] }
  0xb0   : > { %773 = vst.msk [vmem:[#allocation8] sm:$0xff] %vm772_vm4, %v767_v30 }
  0xb1   : > { %786 = vst.msk [vmem:[#allocation8] sm:$0xff] %vm2574_vm5, %v780_v32  ;;  %v782_v41 = vpop.permute.xlu2 %781 }
  0xb2   : > { %799 = vst.msk [vmem:[#allocation8] sm:$0xff] %vm798_vm6, %v793_v26 }
  0xb3   : > { %812 = vst.msk [vmem:[#allocation8] sm:$0xff] %vm811_vm7, %v806_v27  ;;  %v1048_v27 = vld [vmem:[%s2616_s5 + $0x10] sm:$0xff] }
  0xb4   : > { %1072 = vmatpush.msra.mxu1 %v1048_v27  ;;  %v1213_v27 = vld [vmem:[%s2623_s3] sm:$0xff] }
  0xb6   : > { %v819_v35 = vpop.permute.xlu0 %818  ;;  %1073 = vmatpush.msra.mxu1 %v1047_v29 }
  0xb7   : > { %v832_v36 = vpop.permute.xlu1 %831  ;;  %825 = vst.msk [vmem:[#allocation8] sm:$0xff] %vm824_vm9, %v819_v35 }
  0xb8   : > { %838 = vst.msk [vmem:[#allocation8] sm:$0xff] %vm837_vm10, %v832_v36  ;;  %1074 = vmatpush.msra.mxu1 %v1046_v31 }
  0xb9   : > { %v897_v49 = vpop.permute.xlu2 %896 }
  0xbe   : > { %v845_v42 = vpop.permute.xlu0 %844 }
  0xbf   : > { %v756_v43 = vpop.permute.xlu1 %755  ;;  %851 = vst.msk [vmem:[#allocation8] sm:$0xff] %vm850_vm11, %v845_v42 }
  0xc0   : > { %761 = vst.msk [vmem:[#allocation8 + $0x8] sm:$0xff] %vm759_vm3, %v756_v43 }
  0xc1   : > { %864 = vst.msk [vmem:[#allocation8] sm:$0xff] %vm2575_vm12, %v858_v34  ;;  %v821_v52 = vpop.permute.xlu2 %820 }
  0xc6   : > { %v769_v47 = vpop.permute.xlu0 %768 }
  0xc7   : > { %v871_v48 = vpop.permute.xlu1 %870  ;;  %774 = vst.msk [vmem:[#allocation8 + $0x8] sm:$0xff] %vm772_vm4, %v769_v47 }
  0xc8   : > { %877 = vst.msk [vmem:[#allocation8] sm:$0xff] %vm876_vm13, %v871_v48 }
  0xc9   : > { %787 = vst.msk [vmem:[#allocation8 + $0x8] sm:$0xff] %vm2574_vm5, %v782_v41  ;;  %v860_v55 = vpop.permute.xlu2 %859  ;;  %vm928_vm5 = vcmask 490496  }
  0xce   : > { %v884_v50 = vpop.permute.xlu0 %883 }
  0xcf   : > { %v795_v51 = vpop.permute.xlu1 %794  ;;  %890 = vst.msk [vmem:[#allocation8] sm:$0xff] %vm889_vm14, %v884_v50 }
  0xd0   : > { %800 = vst.msk [vmem:[#allocation8 + $0x8] sm:$0xff] %vm798_vm6, %v795_v51 }
  0xd1   : > { %903 = vst.msk [vmem:[#allocation8] sm:$0xff] %vm902_vm15, %v897_v49  ;;  %v899_v59 = vpop.permute.xlu2 %898 }
  0xd6   : > { %v808_v53 = vpop.permute.xlu0 %807 }
  0xd7   : > { %v910_v54 = vpop.permute.xlu1 %909  ;;  %813 = vst.msk [vmem:[#allocation8 + $0x8] sm:$0xff] %vm811_vm7, %v808_v53 }
  0xd8   : > { %916 = vst.msk [vmem:[#allocation8] sm:$0xff] %vm915_vm1, %v910_v54 }
  0xd9   : > { %826 = vst.msk [vmem:[#allocation8 + $0x8] sm:$0xff] %vm824_vm9, %v821_v52 }
  0xde   : > { %v834_v56 = vpop.permute.xlu0 %833 }
  0xdf   : > { %v847_v57 = vpop.permute.xlu1 %846  ;;  %839 = vst.msk [vmem:[#allocation8 + $0x8] sm:$0xff] %vm837_vm10, %v834_v56  ;;  %v918_v58 = vld [vmem:[#allocation8] sm:$0xff] }
  0xe0   : > { %852 = vst.msk [vmem:[#allocation8 + $0x8] sm:$0xff] %vm850_vm11, %v847_v57  ;;  %1705 = vmatmul.msk.f32.vlgmr.msra.gmra.mxu0 %vm928_vm5, %v918_v58 }
  0xe1   : > { %865 = vst.msk [vmem:[#allocation8 + $0x8] sm:$0xff] %vm2575_vm12, %v860_v55  ;;  %vm717_vm12 = vcmask 25600  }
  0xe2   : > { %718 = vst.msk [vmem:[#allocation3 + $0x18] sm:$0x3] %vm717_vm12, %v1847_v0  ;;  %vm1127_vm12 = vcmask 388416  }
  0xe6   : > { %v873_v60 = vpop.permute.xlu0 %872 }
  0xe7   : > { %v886_v61 = vpop.permute.xlu1 %885  ;;  %878 = vst.msk [vmem:[#allocation8 + $0x8] sm:$0xff] %vm876_vm13, %v873_v60  ;;  %vm1135_vm13 = vcmask 454016  }
  0xe8   : > { %891 = vst.msk [vmem:[#allocation8 + $0x8] sm:$0xff] %vm889_vm14, %v886_v61  ;;  %vm1145_vm14 = vcmask 457728  }
  0xe9   : > { %904 = vst.msk [vmem:[#allocation8 + $0x8] sm:$0xff] %vm902_vm15, %v899_v59  ;;  %vm1175_vm15 = vcmask 125952  }
  0xee   : > { %v912_v62 = vpop.permute.xlu0 %911 }
  0xef   : > { %917 = vst.msk [vmem:[#allocation8 + $0x8] sm:$0xff] %vm915_vm1, %v912_v62  ;;  %vm1178_vm1 = vcmask 123904  }
  0xf6   : > { %v919_v63 = vld [vmem:[#allocation8 + $0x8] sm:$0xff] }
  0xf7   : > { %1706 = vmatmul.msk.f32.gmra.mxu0 %vm928_vm5, %v919_v63  ;;  %vm721_vm5 = vcmask 62464  }
  0xf8   : > { %722 = vst.msk [vmem:[#allocation4 + $0x8] sm:$0x3f] %vm721_vm5, %v1847_v0  ;;  %vm725_vm5 = vcmask 257024  }
  0xf9   : > { %726 = vst.msk [vmem:[#allocation6] sm:$0xf] %vm725_vm5, %v1847_v0 }
  0xfa   : > { %727 = vst.msk [vmem:[#allocation7] sm:$0xf] %vm725_vm5, %v1847_v0 }
 0x15d   : > { %v956_v4 = vpop.f32.mrf.mxu0 }
 0x15e   : > { %v964_v5 = vmul.f32 %v963_v2, %v956_v4 }
 0x160   : > { %v967_v6 = vadd.f32 %v966_v3, %v964_v5 }
 0x162   : > { %v969_v7 = vmax.f32 %v967_v6, 0.0 }
 0x164   : > { %971 = vst.msk [vmem:[#allocation3 + $0x5] sm:$0xff] %vm708_vm0, %v969_v7 }
 0x174   : > { %v959_v8 = vpop.f32.mrf.mxu0 }
 0x175   : > { %v965_v9 = vmul.f32 %v963_v2, %v959_v8 }
 0x177   : > { %v968_v10 = vadd.f32 %v966_v3, %v965_v9 }
 0x179   : > { %v970_v11 = vmax.f32 %v968_v10, 0.0 }
 0x17b   : > { %972 = vst.msk [vmem:[#allocation3 + $0xd] sm:$0xff] %vm708_vm0, %v970_v11 }
 0x182   : > { %v990_v12 = vld [vmem:[#allocation3 + $0x3] ss:$2 sm:$0xff]  ;;  %v983_v13 = vld [vmem:[#allocation3 + $0x2] ss:$2 sm:$0xff] }
 0x183   : > { %v976_v14 = vld [vmem:[#allocation3 + $0x1] ss:$2 sm:$0xff]  ;;  %992 = vrot.lane.b32.xlu0 %v990_v12, %s2602_s6  ;;  %985 = vrot.lane.b32.xlu2 %v983_v13, %s2613_s7  ;;  %v973_v15 = vld [vmem:[#allocation3] ss:$2 sm:$0xff]  ;;  %s1862_s6 = smov 64  }
 0x184   : > { %978 = vrot.lane.b32.xlu1 %v976_v14, %s2614_s20  ;;  %974 = vst.msk [vmem:[#allocation8] sm:$0xff] %vm708_vm0, %v973_v15  ;;  %v1011_v16 = vld [vmem:[#allocation3 + $0x6] ss:$2 sm:$0xff]  ;;  %v1004_v17 = vld [vmem:[#allocation3 + $0x5] ss:$2 sm:$0xff]  ;;  %vm719_vm0 = vcmask 64512  }
 0x185   : > { %v997_v18 = vld [vmem:[#allocation3 + $0x4] ss:$2 sm:$0xff]  ;;  %v1032_v19 = vld [vmem:[#allocation3 + $0x9] ss:$2 sm:$0xff]  ;;  %720 = vst.msk [vmem:[#allocation4] sm:$0xff] %vm719_vm0, %v1847_v0 }
 0x186   : > { %v1025_v20 = vld [vmem:[#allocation3 + $0x8] ss:$2 sm:$0xff]  ;;  %v1018_v21 = vld [vmem:[#allocation3 + $0x7] ss:$2 sm:$0xff] }
 0x187   : > { %v1039_v22 = vld [vmem:[#allocation3 + $0xa] ss:$2 sm:$0xff] }
 0x18b   : > { %1013 = vrot.lane.b32.xlu0 %v1011_v16, %s2605_s0  ;;  %1006 = vrot.lane.b32.xlu2 %v1004_v17, %s2604_s24  ;;  %v1222_v17 = vld [vmem:[%s2622_s30 + $0x48] sm:$0xff]  ;;  %s2626_s24 = sld [smem:[#allocation29_spill]] }
 0x18c   : > { %999 = vrot.lane.b32.xlu1 %v997_v18, %s2603_s27  ;;  %v1221_v18 = vld [vmem:[%s2623_s3 + $0x40] sm:$0xff]  ;;  %1233 = vmatpush.msra.mxu3 %v1222_v17 }
 0x18e   : > { %1234 = vmatpush.msra.mxu3 %v1221_v18  ;;  %v1366_v18 = vld [vmem:[%s2526_s12] sm:$0x3] }
 0x193   : > { %1034 = vrot.lane.b32.xlu0 %v1032_v19, %s2608_s4  ;;  %1027 = vrot.lane.b32.xlu2 %v1025_v20, %s2607_s28  ;;  %s2619_s4 = sld [smem:[#allocation25_spill]]  ;;  %v1220_v19 = vld [vmem:[%s2623_s3 + $0x38] sm:$0xff]  ;;  %v1219_v20 = vld [vmem:[%s2623_s3 + $0x30] sm:$0xff] }
 0x194   : > { %1020 = vrot.lane.b32.xlu1 %v1018_v21, %s2606_s26  ;;  %1235 = vmatpush.msra.mxu3 %v1220_v19  ;;  %v1218_v21 = vld [vmem:[%s2623_s3 + $0x28] sm:$0xff]  ;;  %v1367_v19 = vperm.slane %v1366_v18, 0 }
 0x196   : > { %1236 = vmatpush.msra.mxu3 %v1219_v20  ;;  %v1369_v20 = vperm.slane %v1366_v18, 1 }
 0x198   : > { %1237 = vmatpush.msra.mxu3 %v1218_v21 }
 0x199   : > { %v1079_v40 = vld [vmem:[%s2619_s4] sm:$0x3] }
 0x19a   : > { %v1080_v41 = vperm.slane %v1079_v40, 0  ;;  %v1082_v42 = vperm.slane %v1079_v40, 1 }
 0x19c   : > { %1041 = vrot.lane.b32.xlu1 %v1039_v22, %s2609_s29  ;;  %v1217_v22 = vld [vmem:[%s2623_s3 + $0x20] sm:$0xff] }
 0x19d   : > { %1238 = vmatpush.msra.mxu3 %v1217_v22 }
 0x19f   : > { %1239 = vmatpush.msra.mxu3 %v1216_v23 }
 0x1a1   : > { %1240 = vmatpush.msra.mxu3 %v1215_v24 }
 0x1a3   : > { %1241 = vmatpush.msra.mxu3 %v1214_v25 }
 0x1a5   : > { %1242 = vmatpush.msra.mxu3 %v1213_v27 }
 0x1dd   : > { %v986_v26 = vpop.permute.xlu2 %985 }
 0x1e5   : > { %v1007_v32 = vpop.permute.xlu2 %1006 }
 0x1ed   : > { %v1028_v36 = vpop.permute.xlu2 %1027 }
 0x1f5   : > { %v993_v28 = vpop.permute.xlu0 %992 }
 0x1f6   : > { %v979_v30 = vpop.permute.xlu1 %978 }
 0x1f7   : > { %981 = vst.msk [vmem:[#allocation8] sm:$0xff] %vm746_vm2, %v979_v30  ;;  %vm2618_vm2 = vcmask 359744  }
 0x1f8   : > { %988 = vst.msk [vmem:[#allocation8] sm:$0xff] %vm759_vm3, %v986_v26  ;;  %vm1052_vm3 = vcmask 359424  }
 0x1f9   : > { %995 = vst.msk [vmem:[#allocation8] sm:$0xff] %vm772_vm4, %v993_v28  ;;  %vm1087_vm4 = vcmask 60416  }
 0x1fd   : > { %v1014_v33 = vpop.permute.xlu0 %1013 }
 0x1fe   : > { %v1000_v34 = vpop.permute.xlu1 %999 }
 0x1ff   : > { %1002 = vst.msk [vmem:[#allocation8] sm:$0xff] %vm2617_vm8, %v1000_v34  ;;  %vm1194_vm8 = vcmask 386304   ;;  %v1280_v34 = vld [vmem:[%s2523_s9 + $0x40] sm:$0xff] }
 0x200   : > { %1009 = vst.msk [vmem:[#allocation8] sm:$0xff] %vm798_vm6, %v1007_v32  ;;  %vm1095_vm6 = vcmask 126016   ;;  %v1283_v32 = vld [vmem:[%s2523_s9 + $0x58] sm:$0xff] }
 0x201   : > { %1016 = vst.msk [vmem:[#allocation8] sm:$0xff] %vm811_vm7, %v1014_v33  ;;  %vm723_vm7 = vcmask 130048   ;;  %1292 = vmatpush.msrb.mxu1 %v1283_v32  ;;  %v1281_v33 = vld [vmem:[%s2523_s9 + $0x48] sm:$0xff] }
 0x202   : > { %724 = vst.msk [vmem:[#allocation5] sm:$0xff] %vm723_vm7, %v1847_v0  ;;  %v1282_v0 = vld [vmem:[%s2523_s9 + $0x50] sm:$0xff]  ;;  %v1398_v32 = vld [vmem:[%s2527_s13 + $0x48] sm:$0xff] }
 0x203   : > { %1293 = vmatpush.msrb.mxu1 %v1282_v0  ;;  %v1397_v0 = vld [vmem:[%s2527_s13 + $0x40] sm:$0xff] }
 0x205   : > { %v1035_v37 = vpop.permute.xlu0 %1034  ;;  %1294 = vmatpush.msrb.mxu1 %v1281_v33  ;;  %v1396_v33 = vld [vmem:[%s2527_s13 + $0x38] sm:$0xff] }
 0x206   : > { %v1021_v35 = vpop.permute.xlu1 %1020 }
 0x207   : > { %1023 = vst.msk [vmem:[#allocation8] sm:$0xff] %vm824_vm9, %v1021_v35  ;;  %vm1103_vm9 = vcmask 191616   ;;  %v1279_v35 = vld [vmem:[%s2523_s9 + $0x38] sm:$0xff]  ;;  %1295 = vmatpush.msrb.mxu1 %v1280_v34  ;;  %v1395_v34 = vld [vmem:[%s2527_s13 + $0x30] sm:$0xff] }
 0x208   : > { %1030 = vst.msk [vmem:[#allocation8] sm:$0xff] %vm837_vm10, %v1028_v36  ;;  %vm1111_vm10 = vcmask 257216   ;;  %v1278_v36 = vld [vmem:[%s2523_s9 + $0x30] sm:$0xff] }
 0x209   : > { %1037 = vst.msk [vmem:[#allocation8] sm:$0xff] %vm850_vm11, %v1035_v37  ;;  %vm1119_vm11 = vcmask 322816   ;;  %1296 = vmatpush.msrb.mxu1 %v1279_v35  ;;  %v1277_v37 = vld [vmem:[%s2523_s9 + $0x28] sm:$0xff] }
 0x20a   : > { %v1394_v35 = vld [vmem:[%s2527_s13 + $0x28] sm:$0xff] }
 0x20b   : > { %1297 = vmatpush.msrb.mxu1 %v1278_v36  ;;  %v1393_v36 = vld [vmem:[%s2527_s13 + $0x20] sm:$0xff] }
 0x20d   : > { %1298 = vmatpush.msrb.mxu1 %v1277_v37  ;;  %v1392_v37 = vld [vmem:[%s2527_s13 + $0x18] sm:$0xff] }
 0x20e   : > { %v1042_v38 = vpop.permute.xlu1 %1041 }
 0x20f   : > { %1044 = vst.msk [vmem:[#allocation8] sm:$0xff] %vm2618_vm2, %v1042_v38  ;;  %vm1202_vm2 = vcmask 517504   ;;  %v1247_v38 = vld [vmem:[%s2522_s8] sm:$0x3] }
 0x210   : > { %v1250_v40 = vperm.slane %v1247_v38, 1 }
 0x216   : > { %v1045_v39 = vld [vmem:[#allocation8] sm:$0xff] }
 0x217   : > { %1708 = vmatmul.msk.f32.vlgmr.msra.gmra.mxu1 %vm1052_vm3, %v1045_v39  ;;  %vm1210_vm3 = vcmask 648704   ;;  %v1248_v39 = vperm.slane %v1247_v38, 0  ;;  %v1391_v38 = vld [vmem:[%s2527_s13 + $0x10] sm:$0xff] }
 0x294   : > { %v1076_v43 = vpop.f32.mrf.mxu1 }
 0x295   : > { %v1081_v44 = vmul.f32 %v1080_v41, %v1076_v43 }
 0x297   : > { %v1083_v45 = vadd.f32 %v1082_v42, %v1081_v44 }
 0x299   : > { %v1084_v46 = vmax.f32 %v1083_v45, 0.0 }
 0x29b   : > { %1085 = vst.msk [vmem:[#allocation4 + $0x3] sm:$0xff] %vm719_vm0, %v1084_v46  ;;  %vm1186_vm0 = vcmask 255104  }
 0x2a2   : > { %v1106_v47 = vld [vmem:[#allocation4 + $0x3] ss:$2 sm:$0xf]  ;;  %v1098_v48 = vld [vmem:[#allocation4 + $0x2] ss:$2 sm:$0xf] }
 0x2a3   : > { %1108 = vrot.lane.b32.xlu1 %v1106_v47, %s2605_s0  ;;  %1100 = vrot.lane.b32.xlu0 %v1098_v48, %s2603_s27  ;;  %v1090_v49 = vld [vmem:[#allocation4 + $0x1] ss:$2 sm:$0xf]  ;;  %v1086_v50 = vld [vmem:[#allocation4] ss:$2 sm:$0xf] }
 0x2a4   : > { %1092 = vrot.lane.b32.xlu2 %v1090_v49, %s2613_s7  ;;  %1088 = vst.msk [vmem:[#allocation8] sm:$0xf] %vm1087_vm4, %v1086_v50  ;;  %v1130_v51 = vld [vmem:[#allocation4 + $0x6] ss:$2 sm:$0xf]  ;;  %s2620_s0 = sld [smem:[#allocation26_spill]] }
 0x2a5   : > { %v1122_v52 = vld [vmem:[#allocation4 + $0x5] ss:$2 sm:$0xf]  ;;  %v1114_v53 = vld [vmem:[#allocation4 + $0x4] ss:$2 sm:$0xf] }
 0x2a6   : > { %s2621_s7 = sld [smem:[#allocation27_spill]]  ;;  %vm1223_vm4 = vcmask 654336   ;;  %v1276_v48 = vld [vmem:[%s2523_s9 + $0x20] sm:$0xff]  ;;  %v1275_v49 = vld [vmem:[%s2523_s9 + $0x18] sm:$0xff]  ;;  %v1274_v50 = vld [vmem:[%s2523_s9 + $0x10] sm:$0xff] }
 0x2a7   : > { %1299 = vmatpush.msrb.mxu1 %v1276_v48  ;;  %v1454_v48 = vld [vmem:[%s2529_s15 + $0x38] sm:$0xff] }
 0x2a9   : > { %1300 = vmatpush.msrb.mxu1 %v1275_v49  ;;  %v1453_v49 = vld [vmem:[%s2529_s15 + $0x30] sm:$0xff] }
 0x2aa   : > { %v1144_v54 = vld [vmem:[%s2620_s0 + $0x30] sm:$0xff]  ;;  %v1143_v55 = vld [vmem:[%s2620_s0 + $0x28] sm:$0xff]  ;;  %v1142_v57 = vld [vmem:[%s2620_s0 + $0x20] sm:$0xff] }
 0x2ab   : > { %1132 = vrot.lane.b32.xlu1 %v1130_v51, %s2610_s25  ;;  %1124 = vrot.lane.b32.xlu0 %v1122_v52, %s2609_s29  ;;  %v1141_v58 = vld [vmem:[%s2620_s0 + $0x18] sm:$0xff]  ;;  %v1140_v59 = vld [vmem:[%s2620_s0 + $0x10] sm:$0xff]  ;;  %s2625_s29 = sld [smem:[#allocation16_spill]] }
 0x2ac   : > { %1116 = vrot.lane.b32.xlu2 %v1114_v53, %s2607_s28  ;;  %1158 = vmatpush.msra.mxu2 %v1144_v54  ;;  %v1139_v60 = vld [vmem:[%s2620_s0 + $0x8] sm:$0xff]  ;;  %v1138_v61 = vld [vmem:[%s2620_s0] sm:$0xff]  ;;  %s2628_s0 = sld [smem:[#allocation30_spill]] }
 0x2ad   : > { %v1169_v5 = vld [vmem:[%s2621_s7] sm:$0x3]  ;;  %v1273_v51 = vld [vmem:[%s2523_s9 + $0x8] sm:$0xff]  ;;  %1301 = vmatpush.msrb.mxu1 %v1274_v50  ;;  %s2624_s7 = sld [smem:[#allocation13_spill]] }
 0x2ae   : > { %1159 = vmatpush.msra.mxu2 %v1143_v55  ;;  %v1170_v6 = vperm.slane %v1169_v5, 0  ;;  %v1172_v7 = vperm.slane %v1169_v5, 1  ;;  %v1272_v52 = vld [vmem:[%s2523_s9] sm:$0xff]  ;;  %v1340_v5 = vld [vmem:[%s2525_s11 + $0x48] sm:$0xff] }
 0x2af   : > { %1302 = vmatpush.msrb.mxu1 %v1273_v51  ;;  %v1452_v50 = vld [vmem:[%s2529_s15 + $0x28] sm:$0xff]  ;;  %v1424_v51 = vld [vmem:[%s2528_s14] sm:$0x3] }
 0x2b0   : > { %1160 = vmatpush.msra.mxu2 %v1142_v57 }
 0x2b1   : > { %1303 = vmatpush.msrb.mxu1 %v1272_v52  ;;  %v1425_v52 = vperm.slane %v1424_v51, 0 }
 0x2b2   : > { %1161 = vmatpush.msra.mxu2 %v1141_v58 }
 0x2b3   : > { %s701_s4 = sand.u32 1, %s2624_s7  }
 0x2b4   : > { %1162 = vmatpush.msra.mxu2 %v1140_v59  ;;  %s702_s30 = scalar_lea.vmem [#allocation9], %s701_s4 }
 0x2b5   : > { %s1641_s2 = sshll.u32 %s702_s30, 4  ;;  %s1642_s2 = int_to_ptr.vmem [resolvable:$true] %s1641_s2 }
 0x2b6   : > { %1163 = vmatpush.msra.mxu2 %v1139_v60 }
 0x2b8   : > { %1164 = vmatpush.msra.mxu2 %v1138_v61 }
 0x2fe   : > { %v1093_v56 = vpop.permute.xlu2 %1092 }
 0x2ff   : > { %1096 = vst.msk [vmem:[#allocation8] sm:$0xf] %vm1095_vm6, %v1093_v56  ;;  %vm1253_vm6 = vcmask 254976   ;;  %v1308_v56 = vld [vmem:[%s2524_s10] sm:$0x3] }
 0x300   : > { %v1309_v57 = vperm.slane %v1308_v56, 0  ;;  %v1311_v58 = vperm.slane %v1308_v56, 1 }
 0x306   : > { %v1117_v1 = vpop.permute.xlu2 %1116 }
 0x315   : > { %v1109_v62 = vpop.permute.xlu1 %1108  ;;  %v1101_v63 = vpop.permute.xlu0 %1100 }
 0x316   : > { %1104 = vst.msk [vmem:[#allocation8] sm:$0xf] %vm1103_vm9, %v1101_v63  ;;  %vm1262_vm9 = vcmask 517376  }
 0x317   : > { %1112 = vst.msk [vmem:[#allocation8] sm:$0xf] %vm1111_vm10, %v1109_v62  ;;  %vm1269_vm10 = vcmask 779776  }
 0x318   : > { %1120 = vst.msk [vmem:[#allocation8] sm:$0xf] %vm1119_vm11, %v1117_v1  ;;  %vm1284_vm11 = vcmask 785408  }
 0x31d   : > { %v1133_v2 = vpop.permute.xlu1 %1132  ;;  %v1125_v3 = vpop.permute.xlu0 %1124 }
 0x31e   : > { %1128 = vst.msk [vmem:[#allocation8] sm:$0xf] %vm1127_vm12, %v1125_v3  ;;  %v1342_v3 = vld [vmem:[%s2525_s11 + $0x58] sm:$0xff] }
 0x31f   : > { %1136 = vst.msk [vmem:[#allocation8] sm:$0xf] %vm1135_vm13, %v1133_v2  ;;  %1350 = vmatpush.msrb.mxu2 %v1342_v3  ;;  %vm1509_vm13 = vcmask 261120  }
 0x326   : > { %v1137_v4 = vld [vmem:[#allocation8] sm:$0xf] }
 0x327   : > { %1709 = vmatmul.msk.f32.vlgmr.msra.gmra.mxu2 %vm1145_vm14, %v1137_v4  ;;  %v1341_v4 = vld [vmem:[%s2525_s11 + $0x50] sm:$0xff] }
 0x328   : > { %1351 = vmatpush.msrb.mxu2 %v1341_v4 }
 0x32a   : > { %1352 = vmatpush.msrb.mxu2 %v1340_v5 }
 0x3aa   : > { %v1166_v8 = vpop.f32.mrf.mxu2 }
 0x3ab   : > { %v1171_v9 = vmul.f32 %v1170_v6, %v1166_v8  ;;  %v1339_v6 = vld [vmem:[%s2525_s11 + $0x40] sm:$0xff]  ;;  %v1337_v8 = vld [vmem:[%s2525_s11 + $0x30] sm:$0xff] }
 0x3ac   : > { %1353 = vmatpush.msrb.mxu2 %v1339_v6  ;;  %v1507_v6 = vld [vmem:[%s2531_s17 + $0x18] sm:$0xff] }
 0x3ad   : > { %v1173_v10 = vadd.f32 %v1172_v7, %v1171_v9  ;;  %v1338_v7 = vld [vmem:[%s2525_s11 + $0x38] sm:$0xff]  ;;  %v1336_v9 = vld [vmem:[%s2525_s11 + $0x28] sm:$0xff]  ;;  %1525 = vmatpush.msra.mxu1 %v1507_v6 }
 0x3ae   : > { %1354 = vmatpush.msrb.mxu2 %v1338_v7  ;;  %v1506_v7 = vld [vmem:[%s2531_s17 + $0x10] sm:$0xff] }
 0x3af   : > { %v1174_v11 = vmax.f32 %v1173_v10, 0.0  ;;  %v1335_v10 = vld [vmem:[%s2525_s11 + $0x20] sm:$0xff]  ;;  %1526 = vmatpush.msra.mxu1 %v1506_v7 }
 0x3b0   : > { %1355 = vmatpush.msrb.mxu2 %v1337_v8  ;;  %v1505_v8 = vld [vmem:[%s2531_s17 + $0x8] sm:$0xff] }
 0x3b1   : > { %1176 = vst.msk [vmem:[#allocation5 + $0x2] sm:$0xf] %vm1175_vm15, %v1174_v11  ;;  %v1334_v11 = vld [vmem:[%s2525_s11 + $0x18] sm:$0xff]  ;;  %1527 = vmatpush.msra.mxu1 %v1505_v8 }
 0x3b2   : > { %1356 = vmatpush.msrb.mxu2 %v1336_v9  ;;  %v1504_v9 = vld [vmem:[%s2531_s17] sm:$0xff] }
 0x3b3   : > { %1528 = vmatpush.msra.mxu1 %v1504_v9 }
 0x3b4   : > { %1357 = vmatpush.msrb.mxu2 %v1335_v10  ;;  %v1482_v10 = vld [vmem:[%s2530_s16] sm:$0x3] }
 0x3b6   : > { %1358 = vmatpush.msrb.mxu2 %v1334_v11  ;;  %v1863_v11 = vmov 2.0  }
 0x3b7   : > { %1777 = vrcp.f32 %v1863_v11 }
 0x3b8   : > { %v1197_v12 = vld [vmem:[#allocation5 + $0x3] ss:$2 sm:$0x3]  ;;  %v1189_v13 = vld [vmem:[#allocation5 + $0x2] ss:$2 sm:$0x3] }
 0x3b9   : > { %1199 = vrot.lane.b32.xlu1 %v1197_v12, %s2610_s25  ;;  %1191 = vrot.lane.b32.xlu0 %v1189_v13, %s2607_s28  ;;  %v1181_v14 = vld [vmem:[#allocation5 + $0x1] ss:$2 sm:$0x3]  ;;  %v1177_v15 = vld [vmem:[#allocation5] ss:$2 sm:$0x3] }
 0x3ba   : > { %1183 = vrot.lane.b32.xlu2 %v1181_v14, %s2603_s27  ;;  %1179 = vst.msk [vmem:[#allocation8] sm:$0x3] %vm1178_vm1, %v1177_v15  ;;  %v1205_v16 = vld [vmem:[#allocation5 + $0x4] ss:$2 sm:$0x3]  ;;  %v1332_v13 = vld [vmem:[%s2525_s11 + $0x8] sm:$0xff] }
 0x3bb   : > { %v1333_v12 = vld [vmem:[%s2525_s11 + $0x10] sm:$0xff]  ;;  %v1331_v14 = vld [vmem:[%s2525_s11] sm:$0xff]  ;;  %s2627_s27 = sld [smem:[#allocation31_spill]] }
 0x3bc   : > { %1359 = vmatpush.msrb.mxu2 %v1333_v12  ;;  %v1483_v12 = vperm.slane %v1482_v10, 0 }
 0x3be   : > { %1360 = vmatpush.msrb.mxu2 %v1332_v13  ;;  %v1485_v13 = vperm.slane %v1482_v10, 1 }
 0x3c0   : > { %1361 = vmatpush.msrb.mxu2 %v1331_v14  ;;  %v1778_v14 = vpop.eup %1777 }
 0x3c1   : > { %v1497_v18 = vmul.f32 2.0, %v1778_v14  ;;  %vm1501_vm12 = vweird.f32 %v1778_v14  ;;  %s1639_s26 = scalar_lea.hbm %s2627_s27, %s2625_s29 }
 0x3c2   : > { %1207 = vrot.lane.b32.xlu2 %v1205_v16, %s1862_s6  ;;  %s1643_s3 = sshll.u32 %s1639_s26, 4  ;;  %s1644_s3 = int_to_ptr.hbm [resolvable:$true] %s1643_s3 }
 0x3c3   : > { %s1797_s7 = sshra.s32 %s1644_s3, 4  ;;  %s1798_s7 = int_to_ptr.hbm [resolvable:$true] %s1797_s7 }
 0x3c4   : > { %p1804_p0 = scmp.lt.s32.totalorder %s1798_s7, %s2627_s27 }
 0x414   : > { %v1184_v26 = vpop.permute.xlu2 %1183 }
 0x415   : > { %1187 = vst.msk [vmem:[#allocation8] sm:$0x3] %vm1186_vm0, %v1184_v26 }
 0x41c   : > { %v1208_v30 = vpop.permute.xlu2 %1207 }
 0x42b   : > { %v1200_v28 = vpop.permute.xlu1 %1199  ;;  %v1192_v29 = vpop.permute.xlu0 %1191 }
 0x42c   : > { %1195 = vst.msk [vmem:[#allocation8] sm:$0x3] %vm1194_vm8, %v1192_v29  ;;  %vm1628_vm8 = vcmask 57344  }
 0x42d   : > { %1203 = vst.msk [vmem:[#allocation8] sm:$0x3] %vm1202_vm2, %v1200_v28 }
 0x42e   : > { %1211 = vst.msk [vmem:[#allocation8] sm:$0x3] %vm1210_vm3, %v1208_v30  ;;  %v1400_v30 = vld [vmem:[%s2527_s13 + $0x58] sm:$0xff] }
 0x42f   : > { %1408 = vmatpush.msrb.mxu0 %v1400_v30 }
 0x435   : > { %v1212_v31 = vld [vmem:[#allocation8] sm:$0x3] }
 0x436   : > { %1710 = vmatmul.msk.f32.vlgmr.msra.gmra.mxu3 %vm1223_vm4, %v1212_v31  ;;  %v1399_v31 = vld [vmem:[%s2527_s13 + $0x50] sm:$0xff] }
 0x437   : > { %1409 = vmatpush.msrb.mxu0 %v1399_v31 }
 0x439   : > { %1410 = vmatpush.msrb.mxu0 %v1398_v32 }
 0x43b   : > { %1411 = vmatpush.msrb.mxu0 %v1397_v0 }
 0x43d   : > { %1412 = vmatpush.msrb.mxu0 %v1396_v33  ;;  %v1508_v33 = vld [vmem:[%s2532_s18] sm:$0x1] }
 0x43f   : > { %1413 = vmatpush.msrb.mxu0 %v1395_v34 }
 0x441   : > { %1414 = vmatpush.msrb.mxu0 %v1394_v35 }
 0x443   : > { %1415 = vmatpush.msrb.mxu0 %v1393_v36 }
 0x445   : > { %1416 = vmatpush.msrb.mxu0 %v1392_v37 }
 0x447   : > { %1417 = vmatpush.msrb.mxu0 %v1391_v38 }
 0x4b9   : > { %v1244_v41 = vpop.f32.mrf.mxu3 }
 0x4ba   : > { %v1249_v42 = vmul.f32 %v1248_v39, %v1244_v41  ;;  %v1390_v39 = vld [vmem:[%s2527_s13 + $0x8] sm:$0xff] }
 0x4bb   : > { %1418 = vmatpush.msrb.mxu0 %v1390_v39 }
 0x4bc   : > { %v1251_v43 = vadd.f32 %v1250_v40, %v1249_v42  ;;  %v1389_v40 = vld [vmem:[%s2527_s13] sm:$0xff] }
 0x4bd   : > { %1419 = vmatpush.msrb.mxu0 %v1389_v40 }
 0x4be   : > { %v1252_v44 = vmax.f32 %v1251_v43, 0.0 }
 0x4c0   : > { %1254 = vst.msk [vmem:[#allocation6 + $0x1] sm:$0x3] %vm1253_vm6, %v1252_v44  ;;  %v1458_v44 = vld [vmem:[%s2529_s15 + $0x58] sm:$0xff] }
 0x4c1   : > { %1466 = vmatpush.msrb.mxu3 %v1458_v44 }
 0x4c7   : > { %v1264_v45 = vld [vmem:[#allocation6 + $0x2] sm:$0x3]  ;;  %v1255_v47 = vld [vmem:[#allocation6] sm:$0x3] }
 0x4c8   : > { %v1257_v46 = vld [vmem:[#allocation6 + $0x1] sm:$0x3]  ;;  %1266 = vrot.lane.b32.xlu1 %v1264_v45, %s1862_s6  ;;  %1256 = vst.msk [vmem:[#allocation8] sm:$0x3] %vm1253_vm6, %v1255_v47  ;;  %v1457_v45 = vld [vmem:[%s2529_s15 + $0x50] sm:$0xff]  ;;  %v1455_v47 = vld [vmem:[%s2529_s15 + $0x40] sm:$0xff] }
 0x4c9   : > { %1259 = vrot.lane.b32.xlu0 %v1257_v46, %s2607_s28  ;;  %v1315_v24 = vld [vmem:[#allocation6 + $0x1] sm:$0x3]  ;;  %v1456_v46 = vld [vmem:[%s2529_s15 + $0x48] sm:$0xff]  ;;  %1467 = vmatpush.msrb.mxu3 %v1457_v45 }
 0x4cb   : > { %1468 = vmatpush.msrb.mxu3 %v1456_v46 }
 0x4cd   : > { %1469 = vmatpush.msrb.mxu3 %v1455_v47  ;;  %v1575_v47 = vld [vmem:[%s2533_s19 + $0x10] sm:$0xff] }
 0x4cf   : > { %1470 = vmatpush.msrb.mxu3 %v1454_v48  ;;  %v1574_v48 = vld [vmem:[%s2533_s19 + $0x8] sm:$0xff] }
 0x4d1   : > { %1471 = vmatpush.msrb.mxu3 %v1453_v49 }
 0x4d3   : > { %1472 = vmatpush.msrb.mxu3 %v1452_v50  ;;  %v1573_v50 = vld [vmem:[%s2533_s19] sm:$0xff] }
 0x53a   : > { %v1267_v53 = vpop.permute.xlu1 %1266 }
 0x53b   : > { %v1260_v54 = vpop.permute.xlu0 %1259 }
 0x53c   : > { %1263 = vst.msk [vmem:[#allocation8] sm:$0x3] %vm1262_vm9, %v1260_v54 }
 0x53d   : > { %1270 = vst.msk [vmem:[#allocation8] sm:$0x3] %vm1269_vm10, %v1267_v53  ;;  %v1427_v53 = vperm.slane %v1424_v51, 1 }
 0x544   : > { %v1271_v55 = vld [vmem:[#allocation8] sm:$0x3] }
 0x545   : > { %1711 = vmatmul.msk.f32.vlgmr.msrb.gmra.mxu1 %vm1284_vm11, %v1271_v55 }
 0x5c2   : > { %v1305_v59 = vpop.f32.mrf.mxu1 }
 0x5c3   : > { %v1310_v60 = vmul.f32 %v1309_v57, %v1305_v59 }
 0x5c5   : > { %v1312_v61 = vadd.f32 %v1311_v58, %v1310_v60 }
 0x5c7   : > { %v1313_v62 = vmax.f32 %v1312_v61, 0.0  ;;  %v1451_v61 = vld [vmem:[%s2529_s15 + $0x20] sm:$0xff] }
 0x5c8   : > { %1473 = vmatpush.msrb.mxu3 %v1451_v61 }
 0x5c9   : > { %1314 = vst.msk [vmem:[#allocation7 + $0x1] sm:$0x3] %vm1253_vm6, %v1313_v62  ;;  %v1450_v62 = vld [vmem:[%s2529_s15 + $0x18] sm:$0xff] }
 0x5ca   : > { %1474 = vmatpush.msrb.mxu3 %v1450_v62 }
 0x5d0   : > { %v1324_v63 = vld [vmem:[#allocation7 + $0x2] sm:$0x3]  ;;  %v1316_v2 = vld [vmem:[#allocation7] sm:$0x3] }
 0x5d1   : > { %v1318_v1 = vld [vmem:[#allocation7 + $0x1] sm:$0x3]  ;;  %1326 = vrot.lane.b32.xlu0 %v1324_v63, %s1862_s6  ;;  %1317 = vst.msk [vmem:[#allocation8] sm:$0x3] %vm1253_vm6, %v1316_v2  ;;  %v1449_v63 = vld [vmem:[%s2529_s15 + $0x10] sm:$0xff]  ;;  %v1447_v2 = vld [vmem:[%s2529_s15] sm:$0xff] }
 0x5d2   : > { %1320 = vrot.lane.b32.xlu2 %v1318_v1, %s2607_s28  ;;  %v1448_v1 = vld [vmem:[%s2529_s15 + $0x8] sm:$0xff]  ;;  %1475 = vmatpush.msrb.mxu3 %v1449_v63 }
 0x5d4   : > { %1476 = vmatpush.msrb.mxu3 %v1448_v1 }
 0x5d6   : > { %1477 = vmatpush.msrb.mxu3 %v1447_v2 }
 0x62c   : > { %v1321_v15 = vpop.permute.xlu2 %1320 }
 0x62d   : > { %1323 = vst.msk [vmem:[#allocation8] sm:$0x3] %vm1262_vm9, %v1321_v15 }
 0x643   : > { %v1327_v16 = vpop.permute.xlu0 %1326 }
 0x644   : > { %1329 = vst.msk [vmem:[#allocation8] sm:$0x3] %vm1269_vm10, %v1327_v16 }
 0x64b   : > { %v1330_v17 = vld [vmem:[#allocation8] sm:$0x3] }
 0x64c   : > { %1712 = vmatmul.msk.f32.vlgmr.msrb.gmra.mxu2 %vm1284_vm11, %v1330_v17 }
 0x6cf   : > { %v1363_v21 = vpop.f32.mrf.mxu2 }
 0x6d0   : > { %v1368_v22 = vmul.f32 %v1367_v19, %v1363_v21 }
 0x6d2   : > { %v1370_v23 = vadd.f32 %v1369_v20, %v1368_v22  ;;  %v1498_v22 = vsub.f32 1.0, %v1497_v18 }
 0x6d4   : > { %v1371_v25 = vadd.f32 %v1370_v23, %v1315_v24 }
 0x6d6   : > { %v1372_v26 = vmax.f32 %v1371_v25, 0.0  ;;  %v1499_v25 = vmul.f32 %v1778_v14, %v1498_v22 }
 0x6d8   : > { %1373 = vst.msk [vmem:[#allocation6 + $0x1] sm:$0x3] %vm1253_vm6, %v1372_v26 }
 0x6df   : > { %v1382_v27 = vld [vmem:[#allocation6 + $0x2] sm:$0x3]  ;;  %v1374_v29 = vld [vmem:[#allocation6] sm:$0x3] }
 0x6e0   : > { %v1376_v28 = vld [vmem:[#allocation6 + $0x1] sm:$0x3]  ;;  %1384 = vrot.lane.b32.xlu2 %v1382_v27, %s1862_s6  ;;  %1375 = vst.msk [vmem:[#allocation8] sm:$0x3] %vm1253_vm6, %v1374_v29 }
 0x6e1   : > { %1378 = vrot.lane.b32.xlu1 %v1376_v28, %s2607_s28  ;;  %v1431_v19 = vld [vmem:[#allocation6 + $0x1] sm:$0x3]  ;;  %v1500_v28 = vadd.f32 %v1778_v14, %v1499_v25 }
 0x6e3   : > { %v1502_v31 = vsel %vm1501_vm12, %v1778_v14, %v1500_v28 }
 0x73a   : > { %v1385_v42 = vpop.permute.xlu2 %1384 }
 0x753   : > { %v1379_v41 = vpop.permute.xlu1 %1378 }
 0x754   : > { %1381 = vst.msk [vmem:[#allocation8] sm:$0x3] %vm1262_vm9, %v1379_v41 }
 0x755   : > { %1387 = vst.msk [vmem:[#allocation8] sm:$0x3] %vm1269_vm10, %v1385_v42 }
 0x75c   : > { %v1388_v43 = vld [vmem:[#allocation8] sm:$0x3] }
 0x75d   : > { %1713 = vmatmul.msk.f32.vlgmr.msrb.gmra.mxu0 %vm1284_vm11, %v1388_v43  ;;  %v1576_v43 = vld [vmem:[%s2533_s19 + $0x18] sm:$0xff] }
 0x75e   : > { %1593 = vmatpush.msra.mxu2 %v1576_v43 }
 0x760   : > { %1594 = vmatpush.msra.mxu2 %v1575_v47 }
 0x762   : > { %1595 = vmatpush.msra.mxu2 %v1574_v48 }
 0x764   : > { %1596 = vmatpush.msra.mxu2 %v1573_v50 }
 0x7da   : > { %v1421_v54 = vpop.f32.mrf.mxu0 }
 0x7db   : > { %v1426_v55 = vmul.f32 %v1425_v52, %v1421_v54  ;;  %v1603_v52 = vld [vmem:[%s2535_s21 + $0x8] sm:$0xff] }
 0x7dc   : > { %1622 = vmatpush.msra.mxu0 %v1603_v52 }
 0x7dd   : > { %v1428_v56 = vadd.f32 %v1427_v53, %v1426_v55 }
 0x7df   : > { %v1429_v57 = vmax.f32 %v1428_v56, 0.0 }
 0x7e1   : > { %1430 = vst.msk [vmem:[#allocation7 + $0x1] sm:$0x3] %vm1253_vm6, %v1429_v57 }
 0x7e8   : > { %v1432_v58 = vld [vmem:[#allocation7] sm:$0x3]  ;;  %v1440_v59 = vld [vmem:[#allocation7 + $0x2] sm:$0x3] }
 0x7e9   : > { %v1434_v60 = vld [vmem:[#allocation7 + $0x1] sm:$0x3]  ;;  %1433 = vst.msk [vmem:[#allocation8] sm:$0x3] %vm1253_vm6, %v1432_v58  ;;  %1442 = vrot.lane.b32.xlu1 %v1440_v59, %s1862_s6  ;;  %s1799_s6 = scalar_lea.hbm %s1798_s7, 1 }
 0x7ea   : > { %1436 = vrot.lane.b32.xlu0 %v1434_v60, %s2607_s28  ;;  %s1631_s28 = scalar_lea.sflag [#allocation10], %s701_s4  ;;  %p1800_p11 = scmp.ne.s32.totalorder %s1798_s7, %s1799_s6 }
 0x7ec   : > { %p1801_p12 = pnand %p1800_p11, %p2022_p5 }
 0x7ee   : > { %p1802_p13 = pneg %p1801_p12 }
 0x85b   : > { %v1443_v3 = vpop.permute.xlu1 %1442 }
 0x85c   : > { %v1437_v4 = vpop.permute.xlu0 %1436 }
 0x85d   : > { %1439 = vst.msk [vmem:[#allocation8] sm:$0x3] %vm1262_vm9, %v1437_v4 }
 0x85e   : > { %1445 = vst.msk [vmem:[#allocation8] sm:$0x3] %vm1269_vm10, %v1443_v3 }
 0x865   : > { %v1446_v5 = vld [vmem:[#allocation8] sm:$0x3] }
 0x866   : > { %1714 = vmatmul.msk.f32.vlgmr.msrb.gmra.mxu3 %vm1284_vm11, %v1446_v5 }
 0x8e9   : > { %v1479_v15 = vpop.f32.mrf.mxu3 }
 0x8ea   : > { %v1484_v16 = vmul.f32 %v1483_v12, %v1479_v15  ;;  %v1602_v12 = vld [vmem:[%s2535_s21] sm:$0xff] }
 0x8eb   : > { %1623 = vmatpush.msra.mxu0 %v1602_v12 }
 0x8ec   : > { %v1486_v17 = vadd.f32 %v1485_v13, %v1484_v16  ;;  %v1577_v13 = vld [vmem:[%s2626_s24] sm:$0x1] }
 0x8ee   : > { %v1487_v20 = vadd.f32 %v1486_v17, %v1431_v19  ;;  %v1604_v17 = vld [vmem:[%s2628_s0] sm:$0x1]  ;;  %s1803_s0 = scalar_lea.hbm %s2627_s27, 2 }
 0x8ef   : > { %p1805_p1 = scmp.lt.s32.totalorder %s1803_s0, %s1799_s6 }
 0x8f0   : > { %v1488_v21 = vmax.f32 %v1487_v20, 0.0 }
 0x8f1   : > { %p1806_p2 = por %p1805_p1, %p1804_p0 }
 0x8f2   : > { %v1489_v23 = vsel %vm1253_vm6, %v1488_v21, 0.0 }
 0x8f3   : > { %v1490_v24 = vrot.slane %v1489_v23, 4  ;;  %p1807_p3 = pnand %p1806_p2, %p1802_p13 }
 0x8f5   : > { %v1491_v26 = vadd.f32 %v1490_v24, %v1489_v23 }
 0x8f7   : > { %v1492_v27 = vrot.slane %v1491_v26, 2 }
 0x8f9   : > { %v1493_v29 = vadd.f32 %v1492_v27, %v1491_v26 }
 0x8fb   : > { %v1494_v30 = vrot.slane %v1493_v29, 1 }
 0x8fd   : > { %v1495_v32 = vadd.f32 %v1494_v30, %v1493_v29 }
 0x8ff   : > { %v1503_v0 = vmul.f32 %v1502_v31, %v1495_v32 }
 0x901   : > { %1715 = vmatmul.msk.f32.vlgmr.msra.gmra.mxu1 %vm1509_vm13, %v1503_v0 }
 0x97e   : > { %v1530_v34 = vpop.f32.mrf.mxu1 }
 0x97f   : > { %v1531_v35 = vadd.f32 %v1530_v34, %v1508_v33 }
 0x981   : > { %v1534_v36 = vmul.f32 0.70710677, %v1531_v35  ;;  %v1533_v9 = vmul.f32 0.5, %v1531_v35 }
 0x983   : > { %v1535_v37 = vand.u32 2147483647, %v1534_v36  ;;  %vm1568_vm5 = vcmp.ge.f32.partialorder %v1534_v36, 0.0 }
 0x985   : > { %v1536_v38 = vmul.f32 0.3275911, %v1535_v37  ;;  %v1562_v55 = vsub.f32 0.0, %v1535_v37 }
 0x987   : > { %v1537_v39 = vadd.f32 1.0, %v1536_v38  ;;  %v1563_v58 = vmul.f32 %v1562_v55, %v1535_v37 }
 0x989   : > { %1779 = vrcp.f32 %v1537_v39  ;;  %v1549_v44 = vand.u32 2147483648, %v1537_v39  ;;  %v1547_v46 = vand.u32 2147483647, %v1537_v39  ;;  %vm1543_vm15 = vweird.f32 %v1537_v39 }
 0x98a   : > { %v1564_v61 = vmul.f32 1.442695, %v1563_v58 }
 0x98b   : > { %v1550_v51 = vor.u32 1.1754944e-38, %v1549_v44  ;;  %vm1548_vm0 = vcmp.eq.f32.partialorder %v1547_v46, 8.507059e+37 }
 0x98c   : > { %1781 = vpow2.f32 %v1564_v61 }
 0x98f   : > { %v1780_v40 = vpop.eup %1779 }
 0x990   : > { %v1539_v41 = vmul.f32 %v1780_v40, %v1537_v39  ;;  %vm1544_vm14 = vweird.f32 %v1780_v40 }
 0x991   : > { %vm1545_vm1 = vmor %vm1543_vm15, %vm1544_vm14 }
 0x992   : > { %v1540_v42 = vsub.f32 1.0, %v1539_v41  ;;  %v1782_v4 = vpop.eup %1781 }
 0x994   : > { %v1541_v45 = vmul.f32 %v1780_v40, %v1540_v42 }
 0x996   : > { %v1542_v49 = vadd.f32 %v1780_v40, %v1541_v45 }
 0x998   : > { %v1546_v53 = vsel %vm1545_vm1, %v1780_v40, %v1542_v49 }
 0x999   : > { %v1551_v54 = vsel %vm1548_vm0, %v1550_v51, %v1546_v53 }
 0x99a   : > { %v1553_v56 = vmul.f32 1.0614054, %v1551_v54 }
 0x99c   : > { %v1554_v57 = vadd.f32 -1.4531521, %v1553_v56 }
 0x99e   : > { %v1555_v59 = vmul.f32 %v1554_v57, %v1551_v54 }
 0x9a0   : > { %v1556_v60 = vadd.f32 1.4214138, %v1555_v59 }
 0x9a2   : > { %v1557_v62 = vmul.f32 %v1556_v60, %v1551_v54 }
 0x9a4   : > { %v1558_v63 = vadd.f32 -0.28449672, %v1557_v62 }
 0x9a6   : > { %v1559_v1 = vmul.f32 %v1558_v63, %v1551_v54 }
 0x9a8   : > { %v1560_v2 = vadd.f32 0.2548296, %v1559_v1 }
 0x9aa   : > { %v1561_v3 = vmul.f32 %v1560_v2, %v1551_v54 }
 0x9ac   : > { %v1566_v5 = vmul.f32 %v1782_v4, %v1561_v3 }
 0x9ae   : > { %v1567_v6 = vsub.f32 1.0, %v1566_v5 }
 0x9b0   : > { %v1569_v7 = vsub.f32 0.0, %v1567_v6 }
 0x9b2   : > { %v1570_v8 = vsel %vm1568_vm5, %v1567_v6, %v1569_v7 }
 0x9b3   : > { %v1571_v10 = vadd.f32 1.0, %v1570_v8 }
 0x9b5   : > { %v1572_v11 = vmul.f32 %v1571_v10, %v1533_v9 }
 0x9b7   : > { %1716 = vmatmul.msk.f32.vlgmr.msra.gmra.mxu2 %vm1509_vm13, %v1572_v11 }
 0xa3a   : > { %v1598_v14 = vpop.f32.mrf.mxu2 }
 0xa3b   : > { %v1599_v15 = vadd.f32 %v1598_v14, %v1577_v13 }
 0xa3d   : > { %v1601_v16 = vmax.f32 %v1599_v15, 0.0 }
 0xa3f   : > { %1717 = vmatmul.msk.f32.vlgmr.msra.gmra.mxu0 %vm723_vm7, %v1601_v16 }
 0xabc   : > { %v1625_v18 = vpop.f32.mrf.mxu0 }
 0xabd   : > { %v1626_v19 = vadd.f32 %v1625_v18, %v1604_v17 }
 0xabf   : > { %1629 = vst.msk [vmem:[%s702_s30] sm:$0x1] %vm1628_vm8, %v1626_v19 }
 0xac0   : > { %1810 = shalt.err (!%p1807_p3)
}
 0xac1   : > { %1721 = dma.vmem_to_hbm [thread:$0]  (%p2022_p5), %s1642_s2, 16, %s1644_s3, %s1631_s28  }
 0xac2 PF: > { %s2630_s4 = sld [smem:[#allocation15_spill]] }
 0xac3   : > { %s2631_s26 = sld [smem:[#allocation12_spill]] }
 0xac8   : > { %p1727_p4 = scmp.ge.s32.totalorder %s2630_s4, 2 }
 0xac9   : > { %s1655_s20 = sand.u32 1, %s2631_s26  }
 0xaca   : > { %p1724_p7 = pnand %p1727_p4, %p2026_p6  ;;  %s1656_s30 = scalar_lea.sflag [#allocation10], %s1655_s20 }
 0xacc   : > { %p1725_p8 = pneg %p1724_p7 }
 0xace   : > { %1828 = dma.done.wait (%p1725_p8), %s1656_s30, 16  }
 0xacf   : > { %1830 = vsyncadd (%p1725_p8), %s1656_s30, 4294967280  ;;  %s2633_s25 = sld [smem:[#allocation17_spill]] }
 0xad0   : > { %s2634_s4 = sld [smem:[#allocation13_spill]] }
 0xad1   : > { %s2635_s30 = sld [smem:[#allocation14_spill]] }
 0xad2   : > { %s2636_s24 = sld [smem:[#allocation18_spill]] }
 0xad5   : > { %p33_p9 = scmp.ge.s32.totalorder %s2633_s25, 4  }
 0xad7   :  { %35 = sbr.rel (!%p33_p9) target bundleno = 15 (0xf), region = 167 }
 0xadc   :  { %1661 = vsyncpa [#allocation10], 1 }
 0xadd   :  { %1663 = vsyncpa [#allocation10 + $0x1], 1 }

</bundles_post_ra>
